<compile_context>
chip_gen: v7x
topology: tpu7x:2x2x1
jax: 0.10.0
libtpu: 0.0.40
codegen_flags: <defaults>
</compile_context>

<pallas_src>
import functools

import jax
import jax.numpy as jnp
import numpy as np
from jax.experimental import pallas as pl
from jax.experimental.pallas import tpu as pltpu

_LANE = 128
_SUBLANE = 8


def _round_up(x, m):
    return ((x + m - 1) // m) * m


def _encoder_kernel(idx_ref, emb_ref, w_ih_ref, b_gi_ref, w_hh_ref, b_hn_ref,
                    w_fc_ref, b_fc_ref, out_ref, hdec_ref, gi_ref):
    """Fused Encoder forward, single invocation.

    idx_ref : (T*Bp, 1)  int32 token ids (batch padded to Bp)
    emb_ref : (V, E)     embedding table
    w_ih_ref: (E, 3*Hp)  input weight, gates lane-aligned, pad cols zero
    b_gi_ref: (1, 3*Hp)  b_ih + b_hh[r,z] folded, pad lanes zero
    w_hh_ref: (Hp, 3*Hp) recurrent weight, pad rows/cols zero
    b_hn_ref: (1, Hp)    b_hh for the n gate only
    w_fc_ref: (Hp, Dp)   fc weight, pad rows/cols zero
    b_fc_ref: (1, Dp)
    out_ref : (T, Bp, Hp)  GRU outputs (lane-dense; wrapper slices to (T,B,H))
    hdec_ref: (Bp, Dp)     tanh(fc(h_T)) (wrapper slices to (B,D))
    gi_ref  : (T*Bp, 3*Hp) VMEM scratch for the precomputed input projection
    """
    TB = idx_ref.shape[0]
    V = emb_ref.shape[0]
    Hp = w_hh_ref.shape[0]
    T, Bp, _ = out_ref.shape

    # ---- Preamble (off the serial critical path) ------------------------------
    # Embedding gather expressed as a one-hot matmul (exact: one 1.0 per row), then
    # the input projection for ALL timesteps as one MXU matmul, parked in VMEM.
    onehot = jnp.where(
        idx_ref[...] == jax.lax.broadcasted_iota(jnp.int32, (TB, V), 1),
        1.0, 0.0).astype(jnp.float32)                                     # (TB, V)
    x = jnp.dot(onehot, emb_ref[...], preferred_element_type=jnp.float32)  # (TB, E)
    # TODO(synk): nn.Dropout(0.5) on x treated as eval-mode identity.
    gi_ref[...] = (jnp.dot(x, w_ih_ref[...], preferred_element_type=jnp.float32)
                   + b_gi_ref[...])                                        # (TB, 3Hp)

    # Hoist the loop-invariant bias broadcast (JAX does not CSE broadcasts per iter).
    b_hn = jnp.broadcast_to(b_hn_ref[...], (Bp, Hp))

    def step(t, h_prev):
        # Start t*Bp is a multiple of the sublane tile (Bp == 8) by construction.
        gi = gi_ref[pl.ds(t * Bp, Bp), :]                                  # (Bp, 3Hp)
        # TODO(synk): hold W_hh resident in the MXU across steps via
        # pltpu.matmul_push_rhs / matmul_acc_lhs / matmul_pop if the recurrence
        # becomes the measured bottleneck (currently launch/DMA-bound at T=8,B=4).
        gh = jnp.dot(h_prev, w_hh_ref[...],
                     preferred_element_type=jnp.float32)                   # (Bp, 3Hp)
        # Lane-aligned gate slices: offsets 0 / Hp / 2*Hp sit on vreg boundaries.
        r = jax.nn.sigmoid(gi[:, 0:Hp] + gh[:, 0:Hp])
        z = jax.nn.sigmoid(gi[:, Hp:2 * Hp] + gh[:, Hp:2 * Hp])
        n = jnp.tanh(gi[:, 2 * Hp:3 * Hp] + r * (gh[:, 2 * Hp:3 * Hp] + b_hn))
        h_new = (1.0 - z) * n + z * h_prev                 # pad lanes stay exactly 0
        out_ref[t] = h_new.astype(out_ref.dtype)           # full (8,128) unmasked store
        return h_new

    # TODO(synk): for long sequences use a fixed small unroll factor (e.g. 8) instead
    # of a full unroll to bound instruction footprint / vreg live ranges.
    h_last = jax.lax.fori_loop(0, T, step, jnp.zeros((Bp, Hp), jnp.float32),
                               unroll=True)

    hdec_ref[...] = jnp.tanh(
        jnp.dot(h_last, w_fc_ref[...], preferred_element_type=jnp.float32)
        + b_fc_ref[...]).astype(hdec_ref.dtype)


def _encoder_pallas(idx2d, emb, w_ih, b_gi, w_hh, b_hn, w_fc, b_fc, *, T, Bp):
    """Single fused pallas_call for the whole Encoder forward (lane-dense outputs)."""
    TB = idx2d.shape[0]
    V, E = emb.shape
    Hp, G3 = w_hh.shape
    Dp = w_fc.shape[1]

    def full(shape):
        nd = len(shape)
        return pl.BlockSpec(shape, lambda i, _nd=nd: (0,) * _nd)

    out_shape = (
        jax.ShapeDtypeStruct((T, Bp, Hp), jnp.float32),   # GRU outputs (padded)
        jax.ShapeDtypeStruct((Bp, Dp), jnp.float32),      # tanh(fc(h_T)) (padded)
    )

    # Single grid step: everything (gather + projection + recurrence + head) fused.
    # TODO(synk): when T/B grow, tile gi/out over a T-chunk "arbitrary" grid axis
    # (h carried in scratch) and, on v7x with B>=16, add a leading "parallel" batch
    # axis to use both TensorCores; not worth it at T=8, B=4.
    return pl.pallas_call(
        _encoder_kernel,
        out_shape=out_shape,
        grid_spec=pltpu.PrefetchScalarGridSpec(
            num_scalar_prefetch=0,
            grid=(1,),
            in_specs=[
                full((TB, 1)),     # token ids (batch-padded, flattened time-major)
                full((V, E)),      # embedding table
                full((E, G3)),     # W_ih^T (padded gates)
                full((1, G3)),     # folded gi bias
                full((Hp, G3)),    # W_hh^T (padded)
                full((1, Hp)),     # b_hh_n
                full((Hp, Dp)),    # W_fc^T (padded)
                full((1, Dp)),     # b_fc (padded)
            ],
            out_specs=[
                full((T, Bp, Hp)),
                full((Bp, Dp)),
            ],
            scratch_shapes=[pltpu.VMEM((TB, G3), jnp.float32)],
        ),
        compiler_params=pltpu.CompilerParams(
            dimension_semantics=("arbitrary",)),
    )(idx2d, emb, w_ih, b_gi, w_hh, b_hn, w_fc, b_fc)


def encoder_forward(origin_index, packed, *, enc_hidden_size, dec_hidden_size):
    """Full Encoder.forward.  origin_index: (T, B) int32 -> (enc_outputs, enc_hidden)."""
    T, B = origin_index.shape
    Bp = _round_up(B, _SUBLANE)
    idx = origin_index.astype(jnp.int32)
    if Bp != B:
        idx = jnp.pad(idx, ((0, 0), (0, Bp - B)))     # pad batch rows with token 0
    idx2d = idx.reshape(T * Bp, 1)

    out_pad, hdec_pad = _encoder_pallas(
        idx2d, packed["embedding"], packed["w_ih_t_pad"], packed["b_gi"],
        packed["w_hh_t_pad"], packed["b_hn"], packed["w_fc_t_pad"],
        packed["b_fc_pad"], T=T, Bp=Bp)

    enc_outputs = out_pad[:, :B, :enc_hidden_size]
    encoder_hidden = hdec_pad[:B, :dec_hidden_size]
    return enc_outputs, encoder_hidden


def init_params(key, word_index_len, enc_embed_size, enc_hidden_size, dec_hidden_size):
    """PyTorch-layout parameters (same layouts as nn.Embedding / nn.GRU / nn.Linear)."""
    ks = jax.random.split(key, 7)
    s = 0.1
    return {
        "embedding": jax.random.normal(ks[0], (word_index_len, enc_embed_size), jnp.float32) * s,
        "w_ih": jax.random.normal(ks[1], (3 * enc_hidden_size, enc_embed_size), jnp.float32) * s,
        "w_hh": jax.random.normal(ks[2], (3 * enc_hidden_size, enc_hidden_size), jnp.float32) * s,
        "b_ih": jax.random.normal(ks[3], (3 * enc_hidden_size,), jnp.float32) * s,
        "b_hh": jax.random.normal(ks[4], (3 * enc_hidden_size,), jnp.float32) * s,
        "w_fc": jax.random.normal(ks[5], (dec_hidden_size, enc_hidden_size), jnp.float32) * s,
        "b_fc": jax.random.normal(ks[6], (dec_hidden_size,), jnp.float32) * s,
    }


def pack_params(params):
    """Transpose + lane-align (pad each gate / the fc head to 128 lanes) + fold biases."""
    w_ih, w_hh = params["w_ih"], params["w_hh"]      # (3H, E), (3H, H)
    b_ih, b_hh = params["b_ih"], params["b_hh"]      # (3H,),  (3H,)
    w_fc, b_fc = params["w_fc"], params["b_fc"]      # (D, H), (D,)
    H = w_hh.shape[1]
    D = w_fc.shape[0]
    Hp = _round_up(H, _LANE)
    Dp = _round_up(D, _LANE)

    def pad_gate_cols(w_t):                           # (in, 3H) -> (in, 3*Hp)
        out = jnp.zeros((w_t.shape[0], 3 * Hp), jnp.float32)
        for g in range(3):
            out = out.at[:, g * Hp:g * Hp + H].set(w_t[:, g * H:(g + 1) * H])
        return out

    def pad_gate_vec(b):                              # (3H,) -> (1, 3*Hp)
        out = jnp.zeros((1, 3 * Hp), jnp.float32)
        for g in range(3):
            out = out.at[0, g * Hp:g * Hp + H].set(b[g * H:(g + 1) * H])
        return out

    w_ih_t_pad = pad_gate_cols(w_ih.T)                               # (E, 3Hp)
    w_hh_t_pad = jnp.zeros((Hp, 3 * Hp), jnp.float32).at[:H, :].set(
        pad_gate_cols(w_hh.T))                                       # (Hp, 3Hp)

    # Fold b_ih (all gates) and the r/z parts of b_hh into the gi bias; only b_hh_n
    # must stay on the serial path (it sits inside the r*(...) term).
    b_hh_rz = pad_gate_vec(b_hh).at[0, 2 * Hp:2 * Hp + H].set(0.0)
    b_gi = pad_gate_vec(b_ih) + b_hh_rz                              # (1, 3Hp)
    b_hn = jnp.zeros((1, Hp), jnp.float32).at[0, :H].set(b_hh[2 * H:3 * H])

    w_fc_t_pad = jnp.zeros((Hp, Dp), jnp.float32).at[:H, :D].set(w_fc.T)
    b_fc_pad = jnp.zeros((1, Dp), jnp.float32).at[0, :D].set(b_fc)

    return {
        "embedding": params["embedding"].astype(jnp.float32),
        "w_ih_t_pad": w_ih_t_pad,
        "b_gi": b_gi,
        "w_hh_t_pad": w_hh_t_pad,
        "b_hn": b_hn,
        "w_fc_t_pad": w_fc_t_pad,
        "b_fc_pad": b_fc_pad,
    }


def _reference_forward(origin_index, params):
    """Pure-JAX reference (PyTorch GRU semantics) for a sanity check."""
    x = params["embedding"][origin_index]
    H = params["w_hh"].shape[1]
    w_ih_t, w_hh_t = params["w_ih"].T, params["w_hh"].T
    b_ih, b_hh = params["b_ih"][None, :], params["b_hh"][None, :]

    def step(h, xt):
        gi = xt @ w_ih_t + b_ih
        gh = h @ w_hh_t + b_hh
        i_r, i_z, i_n = gi[:, :H], gi[:, H:2 * H], gi[:, 2 * H:]
        h_r, h_z, h_n = gh[:, :H], gh[:, H:2 * H], gh[:, 2 * H:]
        r = jax.nn.sigmoid(i_r + h_r)
        z = jax.nn.sigmoid(i_z + h_z)
        n = jnp.tanh(i_n + r * h_n)
        h_new = (1.0 - z) * n + z * h
        return h_new, h_new

    h0 = jnp.zeros((x.shape[1], H), jnp.float32)
    h_last, outs = jax.lax.scan(step, h0, x)
    hdec = jnp.tanh(h_last @ params["w_fc"].T + params["b_fc"][None, :])
    return outs, hdec


if __name__ == "__main__":
    # Small shapes consistent with the module.
    word_index_len = 64
    enc_embed_size = 32
    enc_hidden_size = 32
    dec_hidden_size = 32
    T, B = 8, 4

    key = jax.random.PRNGKey(0)
    k_idx, k_param = jax.random.split(key)
    params = init_params(k_param, word_index_len, enc_embed_size,
                         enc_hidden_size, dec_hidden_size)
    packed = pack_params(params)
    origin_index = jax.random.randint(k_idx, (T, B), 0, word_index_len, jnp.int32)

    fwd = jax.jit(functools.partial(encoder_forward,
                                    enc_hidden_size=enc_hidden_size,
                                    dec_hidden_size=dec_hidden_size))
    enc_outputs, encoder_hidden = fwd(origin_index, packed)
    jax.block_until_ready((enc_outputs, encoder_hidden))

    ref_out, ref_hid = _reference_forward(origin_index, params)
    np.testing.assert_allclose(np.asarray(enc_outputs), np.asarray(ref_out),
                               rtol=1e-5, atol=1e-5)
    np.testing.assert_allclose(np.asarray(encoder_hidden), np.asarray(ref_hid),
                               rtol=1e-5, atol=1e-5)

    assert enc_outputs.shape == (T, B, enc_hidden_size)
    assert encoder_hidden.shape == (B, dec_hidden_size)
    print("KERNEL_OK")
</pallas_src>

<mosaic_0001>
module attributes {stable_mosaic.version = 11 : i64} {
  func.func @_encoder_kernel(%arg0: i32, %arg1: memref<64x1xi32, #tpu.memory_space<vmem>>, %arg2: memref<64x32xf32, #tpu.memory_space<vmem>>, %arg3: memref<32x384xf32, #tpu.memory_space<vmem>>, %arg4: memref<1x384xf32, #tpu.memory_space<vmem>>, %arg5: memref<128x384xf32, #tpu.memory_space<vmem>>, %arg6: memref<1x128xf32, #tpu.memory_space<vmem>>, %arg7: memref<128x128xf32, #tpu.memory_space<vmem>>, %arg8: memref<1x128xf32, #tpu.memory_space<vmem>>, %arg9: memref<8x8x128xf32, #tpu.memory_space<vmem>>, %arg10: memref<8x128xf32, #tpu.memory_space<vmem>>, %arg11: memref<64x384xf32, #tpu.memory_space<vmem>>) attributes {dimension_semantics = [#tpu.dimension_semantics<arbitrary>], iteration_bounds = array<i64: 1>, scalar_prefetch = 0 : i64, scratch_operands = 1 : i64, tpu.core_type = #tpu.core_type<tc>, window_params = [{pipeline_mode = #tpu.pipeline_mode<synchronous>, transform_indices = @transform_0, window_bounds = array<i64: 64, 1>}, {pipeline_mode = #tpu.pipeline_mode<synchronous>, transform_indices = @transform_1, window_bounds = array<i64: 64, 32>}, {pipeline_mode = #tpu.pipeline_mode<synchronous>, transform_indices = @transform_2, window_bounds = array<i64: 32, 384>}, {pipeline_mode = #tpu.pipeline_mode<synchronous>, transform_indices = @transform_3, window_bounds = array<i64: 1, 384>}, {pipeline_mode = #tpu.pipeline_mode<synchronous>, transform_indices = @transform_4, window_bounds = array<i64: 128, 384>}, {pipeline_mode = #tpu.pipeline_mode<synchronous>, transform_indices = @transform_5, window_bounds = array<i64: 1, 128>}, {pipeline_mode = #tpu.pipeline_mode<synchronous>, transform_indices = @transform_6, window_bounds = array<i64: 128, 128>}, {pipeline_mode = #tpu.pipeline_mode<synchronous>, transform_indices = @transform_7, window_bounds = array<i64: 1, 128>}, {pipeline_mode = #tpu.pipeline_mode<synchronous>, transform_indices = @transform_8, window_bounds = array<i64: 8, 8, 128>}, {pipeline_mode = #tpu.pipeline_mode<synchronous>, transform_indices = @transform_9, window_bounds = array<i64: 8, 128>}]} {
    %c0 = arith.constant 0 : index
    %c0_0 = arith.constant 0 : index
    %0 = vector.load %arg1[%c0, %c0_0] : memref<64x1xi32, #tpu.memory_space<vmem>>, vector<64x1xi32>
    %1 = tpu.iota {dimensions = array<i32: 1>} : vector<64x64xi32>
    %2 = vector.broadcast %0 : vector<64x1xi32> to vector<64x64xi32>
    %3 = arith.cmpi eq, %2, %1 : vector<64x64xi32>
    %cst = arith.constant 1.000000e+00 : f32
    %cst_1 = arith.constant 0.000000e+00 : f32
    %4 = vector.broadcast %cst : f32 to vector<64x64xf32>
    %5 = vector.broadcast %cst_1 : f32 to vector<64x64xf32>
    %6 = arith.select %3, %4, %5 : vector<64x64xi1>, vector<64x64xf32>
    %c0_2 = arith.constant 0 : index
    %c0_3 = arith.constant 0 : index
    %7 = vector.load %arg2[%c0_2, %c0_3] : memref<64x32xf32, #tpu.memory_space<vmem>>, vector<64x32xf32>
    %cst_4 = arith.constant dense<0.000000e+00> : vector<64x32xf32>
    %8 = tpu.matmul %6, %7, %cst_4 {dimension_numbers = #tpu.dot_dimension_numbers<[1], [0], [0], [1], [0, 0, 1, 1], [], []>} : vector<64x64xf32>, vector<64x32xf32>, vector<64x32xf32> -> vector<64x32xf32>
    %c0_5 = arith.constant 0 : index
    %c0_6 = arith.constant 0 : index
    %9 = vector.load %arg3[%c0_5, %c0_6] : memref<32x384xf32, #tpu.memory_space<vmem>>, vector<32x384xf32>
    %cst_7 = arith.constant dense<0.000000e+00> : vector<64x384xf32>
    %10 = tpu.matmul %8, %9, %cst_7 {dimension_numbers = #tpu.dot_dimension_numbers<[1], [0], [0], [1], [0, 0, 1, 1], [], []>} : vector<64x32xf32>, vector<32x384xf32>, vector<64x384xf32> -> vector<64x384xf32>
    %c0_8 = arith.constant 0 : index
    %c0_9 = arith.constant 0 : index
    %11 = vector.load %arg4[%c0_8, %c0_9] : memref<1x384xf32, #tpu.memory_space<vmem>>, vector<1x384xf32>
    %12 = vector.broadcast %11 : vector<1x384xf32> to vector<64x384xf32>
    %13 = arith.addf %10, %12 : vector<64x384xf32>
    %c0_10 = arith.constant 0 : index
    %c0_11 = arith.constant 0 : index
    %14 = vector.load %arg11[%c0_10, %c0_11] : memref<64x384xf32, #tpu.memory_space<vmem>>, vector<64x384xf32>
    tpu.vector_store %arg11[%c0_10, %c0_11], %13 {strides = array<i32>} : memref<64x384xf32, #tpu.memory_space<vmem>>, vector<64x384xf32>,
    %c0_12 = arith.constant 0 : index
    %c0_13 = arith.constant 0 : index
    %15 = vector.load %arg6[%c0_12, %c0_13] : memref<1x128xf32, #tpu.memory_space<vmem>>, vector<1x128xf32>
    %16 = vector.shape_cast %15 : vector<1x128xf32> to vector<1x128xf32>
    %17 = vector.broadcast %16 : vector<1x128xf32> to vector<8x128xf32>
    %cst_14 = arith.constant 0.000000e+00 : f32
    %18 = vector.broadcast %cst_14 : f32 to vector<8x128xf32>
    %c0_i32 = arith.constant 0 : i32
    %c8_i32 = arith.constant 8 : i32
    %19 = arith.muli %c0_i32, %c8_i32 : i32
    %20 = arith.index_cast %19 : i32 to index
    %c0_15 = arith.constant 0 : index
    %21 = vector.load %arg11[%20, %c0_15] : memref<64x384xf32, #tpu.memory_space<vmem>>, vector<8x384xf32>
    %c0_16 = arith.constant 0 : index
    %c0_17 = arith.constant 0 : index
    %22 = vector.load %arg5[%c0_16, %c0_17] : memref<128x384xf32, #tpu.memory_space<vmem>>, vector<128x384xf32>
    %cst_18 = arith.constant dense<0.000000e+00> : vector<8x384xf32>
    %23 = tpu.matmul %18, %22, %cst_18 {dimension_numbers = #tpu.dot_dimension_numbers<[1], [0], [0], [1], [0, 0, 1, 1], [], []>} : vector<8x128xf32>, vector<128x384xf32>, vector<8x384xf32> -> vector<8x384xf32>
    %24 = vector.extract_strided_slice %21 {offsets = [0, 0], sizes = [8, 128], strides = [1, 1]} : vector<8x384xf32> to vector<8x128xf32>
    %25 = vector.extract_strided_slice %23 {offsets = [0, 0], sizes = [8, 128], strides = [1, 1]} : vector<8x384xf32> to vector<8x128xf32>
    %26 = arith.addf %24, %25 : vector<8x128xf32>
    %27 = arith.negf %26 : vector<8x128xf32>
    %28 = math.exp %27 : vector<8x128xf32>
    %cst_19 = arith.constant 1.000000e+00 : f32
    %29 = vector.broadcast %cst_19 : f32 to vector<8x128xf32>
    %30 = arith.addf %29, %28 : vector<8x128xf32>
    %31 = arith.divf %29, %30 : vector<8x128xf32>
    %32 = vector.extract_strided_slice %21 {offsets = [0, 128], sizes = [8, 128], strides = [1, 1]} : vector<8x384xf32> to vector<8x128xf32>
    %33 = vector.extract_strided_slice %23 {offsets = [0, 128], sizes = [8, 128], strides = [1, 1]} : vector<8x384xf32> to vector<8x128xf32>
    %34 = arith.addf %32, %33 : vector<8x128xf32>
    %35 = arith.negf %34 : vector<8x128xf32>
    %36 = math.exp %35 : vector<8x128xf32>
    %cst_20 = arith.constant 1.000000e+00 : f32
    %37 = vector.broadcast %cst_20 : f32 to vector<8x128xf32>
    %38 = arith.addf %37, %36 : vector<8x128xf32>
    %39 = arith.divf %37, %38 : vector<8x128xf32>
    %40 = vector.extract_strided_slice %21 {offsets = [0, 256], sizes = [8, 128], strides = [1, 1]} : vector<8x384xf32> to vector<8x128xf32>
    %41 = vector.extract_strided_slice %23 {offsets = [0, 256], sizes = [8, 128], strides = [1, 1]} : vector<8x384xf32> to vector<8x128xf32>
    %42 = arith.addf %41, %17 : vector<8x128xf32>
    %43 = arith.mulf %31, %42 : vector<8x128xf32>
    %44 = arith.addf %40, %43 : vector<8x128xf32>
    %45 = math.tanh %44 : vector<8x128xf32>
    %cst_21 = arith.constant 1.000000e+00 : f32
    %46 = vector.broadcast %cst_21 : f32 to vector<8x128xf32>
    %47 = arith.subf %46, %39 : vector<8x128xf32>
    %48 = arith.mulf %47, %45 : vector<8x128xf32>
    %49 = arith.mulf %39, %18 : vector<8x128xf32>
    %50 = arith.addf %48, %49 : vector<8x128xf32>
    %51 = arith.index_cast %c0_i32 : i32 to index
    %c0_22 = arith.constant 0 : index
    %c0_23 = arith.constant 0 : index
    %52 = vector.load %arg9[%51, %c0_22, %c0_23] : memref<8x8x128xf32, #tpu.memory_space<vmem>>, vector<1x8x128xf32>
    %53 = vector.shape_cast %52 : vector<1x8x128xf32> to vector<8x128xf32>
    %54 = vector.shape_cast %50 : vector<8x128xf32> to vector<1x8x128xf32>
    tpu.vector_store %arg9[%51, %c0_22, %c0_23], %54 {strides = array<i32>} : memref<8x8x128xf32, #tpu.memory_space<vmem>>, vector<1x8x128xf32>,
    %c1_i32 = arith.constant 1 : i32
    %c8_i32_24 = arith.constant 8 : i32
    %55 = arith.muli %c1_i32, %c8_i32_24 : i32
    %56 = arith.index_cast %55 : i32 to index
    %c0_25 = arith.constant 0 : index
    %57 = vector.load %arg11[%56, %c0_25] : memref<64x384xf32, #tpu.memory_space<vmem>>, vector<8x384xf32>
    %c0_26 = arith.constant 0 : index
    %c0_27 = arith.constant 0 : index
    %58 = vector.load %arg5[%c0_26, %c0_27] : memref<128x384xf32, #tpu.memory_space<vmem>>, vector<128x384xf32>
    %cst_28 = arith.constant dense<0.000000e+00> : vector<8x384xf32>
    %59 = tpu.matmul %50, %58, %cst_28 {dimension_numbers = #tpu.dot_dimension_numbers<[1], [0], [0], [1], [0, 0, 1, 1], [], []>} : vector<8x128xf32>, vector<128x384xf32>, vector<8x384xf32> -> vector<8x384xf32>
    %60 = vector.extract_strided_slice %57 {offsets = [0, 0], sizes = [8, 128], strides = [1, 1]} : vector<8x384xf32> to vector<8x128xf32>
    %61 = vector.extract_strided_slice %59 {offsets = [0, 0], sizes = [8, 128], strides = [1, 1]} : vector<8x384xf32> to vector<8x128xf32>
    %62 = arith.addf %60, %61 : vector<8x128xf32>
    %63 = arith.negf %62 : vector<8x128xf32>
    %64 = math.exp %63 : vector<8x128xf32>
    %cst_29 = arith.constant 1.000000e+00 : f32
    %65 = vector.broadcast %cst_29 : f32 to vector<8x128xf32>
    %66 = arith.addf %65, %64 : vector<8x128xf32>
    %67 = arith.divf %65, %66 : vector<8x128xf32>
    %68 = vector.extract_strided_slice %57 {offsets = [0, 128], sizes = [8, 128], strides = [1, 1]} : vector<8x384xf32> to vector<8x128xf32>
    %69 = vector.extract_strided_slice %59 {offsets = [0, 128], sizes = [8, 128], strides = [1, 1]} : vector<8x384xf32> to vector<8x128xf32>
    %70 = arith.addf %68, %69 : vector<8x128xf32>
    %71 = arith.negf %70 : vector<8x128xf32>
    %72 = math.exp %71 : vector<8x128xf32>
    %cst_30 = arith.constant 1.000000e+00 : f32
    %73 = vector.broadcast %cst_30 : f32 to vector<8x128xf32>
    %74 = arith.addf %73, %72 : vector<8x128xf32>
    %75 = arith.divf %73, %74 : vector<8x128xf32>
    %76 = vector.extract_strided_slice %57 {offsets = [0, 256], sizes = [8, 128], strides = [1, 1]} : vector<8x384xf32> to vector<8x128xf32>
    %77 = vector.extract_strided_slice %59 {offsets = [0, 256], sizes = [8, 128], strides = [1, 1]} : vector<8x384xf32> to vector<8x128xf32>
    %78 = arith.addf %77, %17 : vector<8x128xf32>
    %79 = arith.mulf %67, %78 : vector<8x128xf32>
    %80 = arith.addf %76, %79 : vector<8x128xf32>
    %81 = math.tanh %80 : vector<8x128xf32>
    %cst_31 = arith.constant 1.000000e+00 : f32
    %82 = vector.broadcast %cst_31 : f32 to vector<8x128xf32>
    %83 = arith.subf %82, %75 : vector<8x128xf32>
    %84 = arith.mulf %83, %81 : vector<8x128xf32>
    %85 = arith.mulf %75, %50 : vector<8x128xf32>
    %86 = arith.addf %84, %85 : vector<8x128xf32>
    %87 = arith.index_cast %c1_i32 : i32 to index
    %c0_32 = arith.constant 0 : index
    %c0_33 = arith.constant 0 : index
    %88 = vector.load %arg9[%87, %c0_32, %c0_33] : memref<8x8x128xf32, #tpu.memory_space<vmem>>, vector<1x8x128xf32>
    %89 = vector.shape_cast %88 : vector<1x8x128xf32> to vector<8x128xf32>
    %90 = vector.shape_cast %86 : vector<8x128xf32> to vector<1x8x128xf32>
    tpu.vector_store %arg9[%87, %c0_32, %c0_33], %90 {strides = array<i32>} : memref<8x8x128xf32, #tpu.memory_space<vmem>>, vector<1x8x128xf32>,
    %c2_i32 = arith.constant 2 : i32
    %c8_i32_34 = arith.constant 8 : i32
    %91 = arith.muli %c2_i32, %c8_i32_34 : i32
    %92 = arith.index_cast %91 : i32 to index
    %c0_35 = arith.constant 0 : index
    %93 = vector.load %arg11[%92, %c0_35] : memref<64x384xf32, #tpu.memory_space<vmem>>, vector<8x384xf32>
    %c0_36 = arith.constant 0 : index
    %c0_37 = arith.constant 0 : index
    %94 = vector.load %arg5[%c0_36, %c0_37] : memref<128x384xf32, #tpu.memory_space<vmem>>, vector<128x384xf32>
    %cst_38 = arith.constant dense<0.000000e+00> : vector<8x384xf32>
    %95 = tpu.matmul %86, %94, %cst_38 {dimension_numbers = #tpu.dot_dimension_numbers<[1], [0], [0], [1], [0, 0, 1, 1], [], []>} : vector<8x128xf32>, vector<128x384xf32>, vector<8x384xf32> -> vector<8x384xf32>
    %96 = vector.extract_strided_slice %93 {offsets = [0, 0], sizes = [8, 128], strides = [1, 1]} : vector<8x384xf32> to vector<8x128xf32>
    %97 = vector.extract_strided_slice %95 {offsets = [0, 0], sizes = [8, 128], strides = [1, 1]} : vector<8x384xf32> to vector<8x128xf32>
    %98 = arith.addf %96, %97 : vector<8x128xf32>
    %99 = arith.negf %98 : vector<8x128xf32>
    %100 = math.exp %99 : vector<8x128xf32>
    %cst_39 = arith.constant 1.000000e+00 : f32
    %101 = vector.broadcast %cst_39 : f32 to vector<8x128xf32>
    %102 = arith.addf %101, %100 : vector<8x128xf32>
    %103 = arith.divf %101, %102 : vector<8x128xf32>
    %104 = vector.extract_strided_slice %93 {offsets = [0, 128], sizes = [8, 128], strides = [1, 1]} : vector<8x384xf32> to vector<8x128xf32>
    %105 = vector.extract_strided_slice %95 {offsets = [0, 128], sizes = [8, 128], strides = [1, 1]} : vector<8x384xf32> to vector<8x128xf32>
    %106 = arith.addf %104, %105 : vector<8x128xf32>
    %107 = arith.negf %106 : vector<8x128xf32>
    %108 = math.exp %107 : vector<8x128xf32>
    %cst_40 = arith.constant 1.000000e+00 : f32
    %109 = vector.broadcast %cst_40 : f32 to vector<8x128xf32>
    %110 = arith.addf %109, %108 : vector<8x128xf32>
    %111 = arith.divf %109, %110 : vector<8x128xf32>
    %112 = vector.extract_strided_slice %93 {offsets = [0, 256], sizes = [8, 128], strides = [1, 1]} : vector<8x384xf32> to vector<8x128xf32>
    %113 = vector.extract_strided_slice %95 {offsets = [0, 256], sizes = [8, 128], strides = [1, 1]} : vector<8x384xf32> to vector<8x128xf32>
    %114 = arith.addf %113, %17 : vector<8x128xf32>
    %115 = arith.mulf %103, %114 : vector<8x128xf32>
    %116 = arith.addf %112, %115 : vector<8x128xf32>
    %117 = math.tanh %116 : vector<8x128xf32>
    %cst_41 = arith.constant 1.000000e+00 : f32
    %118 = vector.broadcast %cst_41 : f32 to vector<8x128xf32>
    %119 = arith.subf %118, %111 : vector<8x128xf32>
    %120 = arith.mulf %119, %117 : vector<8x128xf32>
    %121 = arith.mulf %111, %86 : vector<8x128xf32>
    %122 = arith.addf %120, %121 : vector<8x128xf32>
    %123 = arith.index_cast %c2_i32 : i32 to index
    %c0_42 = arith.constant 0 : index
    %c0_43 = arith.constant 0 : index
    %124 = vector.load %arg9[%123, %c0_42, %c0_43] : memref<8x8x128xf32, #tpu.memory_space<vmem>>, vector<1x8x128xf32>
    %125 = vector.shape_cast %124 : vector<1x8x128xf32> to vector<8x128xf32>
    %126 = vector.shape_cast %122 : vector<8x128xf32> to vector<1x8x128xf32>
    tpu.vector_store %arg9[%123, %c0_42, %c0_43], %126 {strides = array<i32>} : memref<8x8x128xf32, #tpu.memory_space<vmem>>, vector<1x8x128xf32>,
    %c3_i32 = arith.constant 3 : i32
    %c8_i32_44 = arith.constant 8 : i32
    %127 = arith.muli %c3_i32, %c8_i32_44 : i32
    %128 = arith.index_cast %127 : i32 to index
    %c0_45 = arith.constant 0 : index
    %129 = vector.load %arg11[%128, %c0_45] : memref<64x384xf32, #tpu.memory_space<vmem>>, vector<8x384xf32>
    %c0_46 = arith.constant 0 : index
    %c0_47 = arith.constant 0 : index
    %130 = vector.load %arg5[%c0_46, %c0_47] : memref<128x384xf32, #tpu.memory_space<vmem>>, vector<128x384xf32>
    %cst_48 = arith.constant dense<0.000000e+00> : vector<8x384xf32>
    %131 = tpu.matmul %122, %130, %cst_48 {dimension_numbers = #tpu.dot_dimension_numbers<[1], [0], [0], [1], [0, 0, 1, 1], [], []>} : vector<8x128xf32>, vector<128x384xf32>, vector<8x384xf32> -> vector<8x384xf32>
    %132 = vector.extract_strided_slice %129 {offsets = [0, 0], sizes = [8, 128], strides = [1, 1]} : vector<8x384xf32> to vector<8x128xf32>
    %133 = vector.extract_strided_slice %131 {offsets = [0, 0], sizes = [8, 128], strides = [1, 1]} : vector<8x384xf32> to vector<8x128xf32>
    %134 = arith.addf %132, %133 : vector<8x128xf32>
    %135 = arith.negf %134 : vector<8x128xf32>
    %136 = math.exp %135 : vector<8x128xf32>
    %cst_49 = arith.constant 1.000000e+00 : f32
    %137 = vector.broadcast %cst_49 : f32 to vector<8x128xf32>
    %138 = arith.addf %137, %136 : vector<8x128xf32>
    %139 = arith.divf %137, %138 : vector<8x128xf32>
    %140 = vector.extract_strided_slice %129 {offsets = [0, 128], sizes = [8, 128], strides = [1, 1]} : vector<8x384xf32> to vector<8x128xf32>
    %141 = vector.extract_strided_slice %131 {offsets = [0, 128], sizes = [8, 128], strides = [1, 1]} : vector<8x384xf32> to vector<8x128xf32>
    %142 = arith.addf %140, %141 : vector<8x128xf32>
    %143 = arith.negf %142 : vector<8x128xf32>
    %144 = math.exp %143 : vector<8x128xf32>
    %cst_50 = arith.constant 1.000000e+00 : f32
    %145 = vector.broadcast %cst_50 : f32 to vector<8x128xf32>
    %146 = arith.addf %145, %144 : vector<8x128xf32>
    %147 = arith.divf %145, %146 : vector<8x128xf32>
    %148 = vector.extract_strided_slice %129 {offsets = [0, 256], sizes = [8, 128], strides = [1, 1]} : vector<8x384xf32> to vector<8x128xf32>
    %149 = vector.extract_strided_slice %131 {offsets = [0, 256], sizes = [8, 128], strides = [1, 1]} : vector<8x384xf32> to vector<8x128xf32>
    %150 = arith.addf %149, %17 : vector<8x128xf32>
    %151 = arith.mulf %139, %150 : vector<8x128xf32>
    %152 = arith.addf %148, %151 : vector<8x128xf32>
    %153 = math.tanh %152 : vector<8x128xf32>
    %cst_51 = arith.constant 1.000000e+00 : f32
    %154 = vector.broadcast %cst_51 : f32 to vector<8x128xf32>
    %155 = arith.subf %154, %147 : vector<8x128xf32>
    %156 = arith.mulf %155, %153 : vector<8x128xf32>
    %157 = arith.mulf %147, %122 : vector<8x128xf32>
    %158 = arith.addf %156, %157 : vector<8x128xf32>
    %159 = arith.index_cast %c3_i32 : i32 to index
    %c0_52 = arith.constant 0 : index
    %c0_53 = arith.constant 0 : index
    %160 = vector.load %arg9[%159, %c0_52, %c0_53] : memref<8x8x128xf32, #tpu.memory_space<vmem>>, vector<1x8x128xf32>
    %161 = vector.shape_cast %160 : vector<1x8x128xf32> to vector<8x128xf32>
    %162 = vector.shape_cast %158 : vector<8x128xf32> to vector<1x8x128xf32>
    tpu.vector_store %arg9[%159, %c0_52, %c0_53], %162 {strides = array<i32>} : memref<8x8x128xf32, #tpu.memory_space<vmem>>, vector<1x8x128xf32>,
    %c4_i32 = arith.constant 4 : i32
    %c8_i32_54 = arith.constant 8 : i32
    %163 = arith.muli %c4_i32, %c8_i32_54 : i32
    %164 = arith.index_cast %163 : i32 to index
    %c0_55 = arith.constant 0 : index
    %165 = vector.load %arg11[%164, %c0_55] : memref<64x384xf32, #tpu.memory_space<vmem>>, vector<8x384xf32>
    %c0_56 = arith.constant 0 : index
    %c0_57 = arith.constant 0 : index
    %166 = vector.load %arg5[%c0_56, %c0_57] : memref<128x384xf32, #tpu.memory_space<vmem>>, vector<128x384xf32>
    %cst_58 = arith.constant dense<0.000000e+00> : vector<8x384xf32>
    %167 = tpu.matmul %158, %166, %cst_58 {dimension_numbers = #tpu.dot_dimension_numbers<[1], [0], [0], [1], [0, 0, 1, 1], [], []>} : vector<8x128xf32>, vector<128x384xf32>, vector<8x384xf32> -> vector<8x384xf32>
    %168 = vector.extract_strided_slice %165 {offsets = [0, 0], sizes = [8, 128], strides = [1, 1]} : vector<8x384xf32> to vector<8x128xf32>
    %169 = vector.extract_strided_slice %167 {offsets = [0, 0], sizes = [8, 128], strides = [1, 1]} : vector<8x384xf32> to vector<8x128xf32>
    %170 = arith.addf %168, %169 : vector<8x128xf32>
    %171 = arith.negf %170 : vector<8x128xf32>
    %172 = math.exp %171 : vector<8x128xf32>
    %cst_59 = arith.constant 1.000000e+00 : f32
    %173 = vector.broadcast %cst_59 : f32 to vector<8x128xf32>
    %174 = arith.addf %173, %172 : vector<8x128xf32>
    %175 = arith.divf %173, %174 : vector<8x128xf32>
    %176 = vector.extract_strided_slice %165 {offsets = [0, 128], sizes = [8, 128], strides = [1, 1]} : vector<8x384xf32> to vector<8x128xf32>
    %177 = vector.extract_strided_slice %167 {offsets = [0, 128], sizes = [8, 128], strides = [1, 1]} : vector<8x384xf32> to vector<8x128xf32>
    %178 = arith.addf %176, %177 : vector<8x128xf32>
    %179 = arith.negf %178 : vector<8x128xf32>
    %180 = math.exp %179 : vector<8x128xf32>
    %cst_60 = arith.constant 1.000000e+00 : f32
    %181 = vector.broadcast %cst_60 : f32 to vector<8x128xf32>
    %182 = arith.addf %181, %180 : vector<8x128xf32>
    %183 = arith.divf %181, %182 : vector<8x128xf32>
    %184 = vector.extract_strided_slice %165 {offsets = [0, 256], sizes = [8, 128], strides = [1, 1]} : vector<8x384xf32> to vector<8x128xf32>
    %185 = vector.extract_strided_slice %167 {offsets = [0, 256], sizes = [8, 128], strides = [1, 1]} : vector<8x384xf32> to vector<8x128xf32>
    %186 = arith.addf %185, %17 : vector<8x128xf32>
    %187 = arith.mulf %175, %186 : vector<8x128xf32>
    %188 = arith.addf %184, %187 : vector<8x128xf32>
    %189 = math.tanh %188 : vector<8x128xf32>
    %cst_61 = arith.constant 1.000000e+00 : f32
    %190 = vector.broadcast %cst_61 : f32 to vector<8x128xf32>
    %191 = arith.subf %190, %183 : vector<8x128xf32>
    %192 = arith.mulf %191, %189 : vector<8x128xf32>
    %193 = arith.mulf %183, %158 : vector<8x128xf32>
    %194 = arith.addf %192, %193 : vector<8x128xf32>
    %195 = arith.index_cast %c4_i32 : i32 to index
    %c0_62 = arith.constant 0 : index
    %c0_63 = arith.constant 0 : index
    %196 = vector.load %arg9[%195, %c0_62, %c0_63] : memref<8x8x128xf32, #tpu.memory_space<vmem>>, vector<1x8x128xf32>
    %197 = vector.shape_cast %196 : vector<1x8x128xf32> to vector<8x128xf32>
    %198 = vector.shape_cast %194 : vector<8x128xf32> to vector<1x8x128xf32>
    tpu.vector_store %arg9[%195, %c0_62, %c0_63], %198 {strides = array<i32>} : memref<8x8x128xf32, #tpu.memory_space<vmem>>, vector<1x8x128xf32>,
    %c5_i32 = arith.constant 5 : i32
    %c8_i32_64 = arith.constant 8 : i32
    %199 = arith.muli %c5_i32, %c8_i32_64 : i32
    %200 = arith.index_cast %199 : i32 to index
    %c0_65 = arith.constant 0 : index
    %201 = vector.load %arg11[%200, %c0_65] : memref<64x384xf32, #tpu.memory_space<vmem>>, vector<8x384xf32>
    %c0_66 = arith.constant 0 : index
    %c0_67 = arith.constant 0 : index
    %202 = vector.load %arg5[%c0_66, %c0_67] : memref<128x384xf32, #tpu.memory_space<vmem>>, vector<128x384xf32>
    %cst_68 = arith.constant dense<0.000000e+00> : vector<8x384xf32>
    %203 = tpu.matmul %194, %202, %cst_68 {dimension_numbers = #tpu.dot_dimension_numbers<[1], [0], [0], [1], [0, 0, 1, 1], [], []>} : vector<8x128xf32>, vector<128x384xf32>, vector<8x384xf32> -> vector<8x384xf32>
    %204 = vector.extract_strided_slice %201 {offsets = [0, 0], sizes = [8, 128], strides = [1, 1]} : vector<8x384xf32> to vector<8x128xf32>
    %205 = vector.extract_strided_slice %203 {offsets = [0, 0], sizes = [8, 128], strides = [1, 1]} : vector<8x384xf32> to vector<8x128xf32>
    %206 = arith.addf %204, %205 : vector<8x128xf32>
    %207 = arith.negf %206 : vector<8x128xf32>
    %208 = math.exp %207 : vector<8x128xf32>
    %cst_69 = arith.constant 1.000000e+00 : f32
    %209 = vector.broadcast %cst_69 : f32 to vector<8x128xf32>
    %210 = arith.addf %209, %208 : vector<8x128xf32>
    %211 = arith.divf %209, %210 : vector<8x128xf32>
    %212 = vector.extract_strided_slice %201 {offsets = [0, 128], sizes = [8, 128], strides = [1, 1]} : vector<8x384xf32> to vector<8x128xf32>
    %213 = vector.extract_strided_slice %203 {offsets = [0, 128], sizes = [8, 128], strides = [1, 1]} : vector<8x384xf32> to vector<8x128xf32>
    %214 = arith.addf %212, %213 : vector<8x128xf32>
    %215 = arith.negf %214 : vector<8x128xf32>
    %216 = math.exp %215 : vector<8x128xf32>
    %cst_70 = arith.constant 1.000000e+00 : f32
    %217 = vector.broadcast %cst_70 : f32 to vector<8x128xf32>
    %218 = arith.addf %217, %216 : vector<8x128xf32>
    %219 = arith.divf %217, %218 : vector<8x128xf32>
    %220 = vector.extract_strided_slice %201 {offsets = [0, 256], sizes = [8, 128], strides = [1, 1]} : vector<8x384xf32> to vector<8x128xf32>
    %221 = vector.extract_strided_slice %203 {offsets = [0, 256], sizes = [8, 128], strides = [1, 1]} : vector<8x384xf32> to vector<8x128xf32>
    %222 = arith.addf %221, %17 : vector<8x128xf32>
    %223 = arith.mulf %211, %222 : vector<8x128xf32>
    %224 = arith.addf %220, %223 : vector<8x128xf32>
    %225 = math.tanh %224 : vector<8x128xf32>
    %cst_71 = arith.constant 1.000000e+00 : f32
    %226 = vector.broadcast %cst_71 : f32 to vector<8x128xf32>
    %227 = arith.subf %226, %219 : vector<8x128xf32>
    %228 = arith.mulf %227, %225 : vector<8x128xf32>
    %229 = arith.mulf %219, %194 : vector<8x128xf32>
    %230 = arith.addf %228, %229 : vector<8x128xf32>
    %231 = arith.index_cast %c5_i32 : i32 to index
    %c0_72 = arith.constant 0 : index
    %c0_73 = arith.constant 0 : index
    %232 = vector.load %arg9[%231, %c0_72, %c0_73] : memref<8x8x128xf32, #tpu.memory_space<vmem>>, vector<1x8x128xf32>
    %233 = vector.shape_cast %232 : vector<1x8x128xf32> to vector<8x128xf32>
    %234 = vector.shape_cast %230 : vector<8x128xf32> to vector<1x8x128xf32>
    tpu.vector_store %arg9[%231, %c0_72, %c0_73], %234 {strides = array<i32>} : memref<8x8x128xf32, #tpu.memory_space<vmem>>, vector<1x8x128xf32>,
    %c6_i32 = arith.constant 6 : i32
    %c8_i32_74 = arith.constant 8 : i32
    %235 = arith.muli %c6_i32, %c8_i32_74 : i32
    %236 = arith.index_cast %235 : i32 to index
    %c0_75 = arith.constant 0 : index
    %237 = vector.load %arg11[%236, %c0_75] : memref<64x384xf32, #tpu.memory_space<vmem>>, vector<8x384xf32>
    %c0_76 = arith.constant 0 : index
    %c0_77 = arith.constant 0 : index
    %238 = vector.load %arg5[%c0_76, %c0_77] : memref<128x384xf32, #tpu.memory_space<vmem>>, vector<128x384xf32>
    %cst_78 = arith.constant dense<0.000000e+00> : vector<8x384xf32>
    %239 = tpu.matmul %230, %238, %cst_78 {dimension_numbers = #tpu.dot_dimension_numbers<[1], [0], [0], [1], [0, 0, 1, 1], [], []>} : vector<8x128xf32>, vector<128x384xf32>, vector<8x384xf32> -> vector<8x384xf32>
    %240 = vector.extract_strided_slice %237 {offsets = [0, 0], sizes = [8, 128], strides = [1, 1]} : vector<8x384xf32> to vector<8x128xf32>
    %241 = vector.extract_strided_slice %239 {offsets = [0, 0], sizes = [8, 128], strides = [1, 1]} : vector<8x384xf32> to vector<8x128xf32>
    %242 = arith.addf %240, %241 : vector<8x128xf32>
    %243 = arith.negf %242 : vector<8x128xf32>
    %244 = math.exp %243 : vector<8x128xf32>
    %cst_79 = arith.constant 1.000000e+00 : f32
    %245 = vector.broadcast %cst_79 : f32 to vector<8x128xf32>
    %246 = arith.addf %245, %244 : vector<8x128xf32>
    %247 = arith.divf %245, %246 : vector<8x128xf32>
    %248 = vector.extract_strided_slice %237 {offsets = [0, 128], sizes = [8, 128], strides = [1, 1]} : vector<8x384xf32> to vector<8x128xf32>
    %249 = vector.extract_strided_slice %239 {offsets = [0, 128], sizes = [8, 128], strides = [1, 1]} : vector<8x384xf32> to vector<8x128xf32>
    %250 = arith.addf %248, %249 : vector<8x128xf32>
    %251 = arith.negf %250 : vector<8x128xf32>
    %252 = math.exp %251 : vector<8x128xf32>
    %cst_80 = arith.constant 1.000000e+00 : f32
    %253 = vector.broadcast %cst_80 : f32 to vector<8x128xf32>
    %254 = arith.addf %253, %252 : vector<8x128xf32>
    %255 = arith.divf %253, %254 : vector<8x128xf32>
    %256 = vector.extract_strided_slice %237 {offsets = [0, 256], sizes = [8, 128], strides = [1, 1]} : vector<8x384xf32> to vector<8x128xf32>
    %257 = vector.extract_strided_slice %239 {offsets = [0, 256], sizes = [8, 128], strides = [1, 1]} : vector<8x384xf32> to vector<8x128xf32>
    %258 = arith.addf %257, %17 : vector<8x128xf32>
    %259 = arith.mulf %247, %258 : vector<8x128xf32>
    %260 = arith.addf %256, %259 : vector<8x128xf32>
    %261 = math.tanh %260 : vector<8x128xf32>
    %cst_81 = arith.constant 1.000000e+00 : f32
    %262 = vector.broadcast %cst_81 : f32 to vector<8x128xf32>
    %263 = arith.subf %262, %255 : vector<8x128xf32>
    %264 = arith.mulf %263, %261 : vector<8x128xf32>
    %265 = arith.mulf %255, %230 : vector<8x128xf32>
    %266 = arith.addf %264, %265 : vector<8x128xf32>
    %267 = arith.index_cast %c6_i32 : i32 to index
    %c0_82 = arith.constant 0 : index
    %c0_83 = arith.constant 0 : index
    %268 = vector.load %arg9[%267, %c0_82, %c0_83] : memref<8x8x128xf32, #tpu.memory_space<vmem>>, vector<1x8x128xf32>
    %269 = vector.shape_cast %268 : vector<1x8x128xf32> to vector<8x128xf32>
    %270 = vector.shape_cast %266 : vector<8x128xf32> to vector<1x8x128xf32>
    tpu.vector_store %arg9[%267, %c0_82, %c0_83], %270 {strides = array<i32>} : memref<8x8x128xf32, #tpu.memory_space<vmem>>, vector<1x8x128xf32>,
    %c7_i32 = arith.constant 7 : i32
    %c8_i32_84 = arith.constant 8 : i32
    %271 = arith.muli %c7_i32, %c8_i32_84 : i32
    %272 = arith.index_cast %271 : i32 to index
    %c0_85 = arith.constant 0 : index
    %273 = vector.load %arg11[%272, %c0_85] : memref<64x384xf32, #tpu.memory_space<vmem>>, vector<8x384xf32>
    %c0_86 = arith.constant 0 : index
    %c0_87 = arith.constant 0 : index
    %274 = vector.load %arg5[%c0_86, %c0_87] : memref<128x384xf32, #tpu.memory_space<vmem>>, vector<128x384xf32>
    %cst_88 = arith.constant dense<0.000000e+00> : vector<8x384xf32>
    %275 = tpu.matmul %266, %274, %cst_88 {dimension_numbers = #tpu.dot_dimension_numbers<[1], [0], [0], [1], [0, 0, 1, 1], [], []>} : vector<8x128xf32>, vector<128x384xf32>, vector<8x384xf32> -> vector<8x384xf32>
    %276 = vector.extract_strided_slice %273 {offsets = [0, 0], sizes = [8, 128], strides = [1, 1]} : vector<8x384xf32> to vector<8x128xf32>
    %277 = vector.extract_strided_slice %275 {offsets = [0, 0], sizes = [8, 128], strides = [1, 1]} : vector<8x384xf32> to vector<8x128xf32>
    %278 = arith.addf %276, %277 : vector<8x128xf32>
    %279 = arith.negf %278 : vector<8x128xf32>
    %280 = math.exp %279 : vector<8x128xf32>
    %cst_89 = arith.constant 1.000000e+00 : f32
    %281 = vector.broadcast %cst_89 : f32 to vector<8x128xf32>
    %282 = arith.addf %281, %280 : vector<8x128xf32>
    %283 = arith.divf %281, %282 : vector<8x128xf32>
    %284 = vector.extract_strided_slice %273 {offsets = [0, 128], sizes = [8, 128], strides = [1, 1]} : vector<8x384xf32> to vector<8x128xf32>
    %285 = vector.extract_strided_slice %275 {offsets = [0, 128], sizes = [8, 128], strides = [1, 1]} : vector<8x384xf32> to vector<8x128xf32>
    %286 = arith.addf %284, %285 : vector<8x128xf32>
    %287 = arith.negf %286 : vector<8x128xf32>
    %288 = math.exp %287 : vector<8x128xf32>
    %cst_90 = arith.constant 1.000000e+00 : f32
    %289 = vector.broadcast %cst_90 : f32 to vector<8x128xf32>
    %290 = arith.addf %289, %288 : vector<8x128xf32>
    %291 = arith.divf %289, %290 : vector<8x128xf32>
    %292 = vector.extract_strided_slice %273 {offsets = [0, 256], sizes = [8, 128], strides = [1, 1]} : vector<8x384xf32> to vector<8x128xf32>
    %293 = vector.extract_strided_slice %275 {offsets = [0, 256], sizes = [8, 128], strides = [1, 1]} : vector<8x384xf32> to vector<8x128xf32>
    %294 = arith.addf %293, %17 : vector<8x128xf32>
    %295 = arith.mulf %283, %294 : vector<8x128xf32>
    %296 = arith.addf %292, %295 : vector<8x128xf32>
    %297 = math.tanh %296 : vector<8x128xf32>
    %cst_91 = arith.constant 1.000000e+00 : f32
    %298 = vector.broadcast %cst_91 : f32 to vector<8x128xf32>
    %299 = arith.subf %298, %291 : vector<8x128xf32>
    %300 = arith.mulf %299, %297 : vector<8x128xf32>
    %301 = arith.mulf %291, %266 : vector<8x128xf32>
    %302 = arith.addf %300, %301 : vector<8x128xf32>
    %303 = arith.index_cast %c7_i32 : i32 to index
    %c0_92 = arith.constant 0 : index
    %c0_93 = arith.constant 0 : index
    %304 = vector.load %arg9[%303, %c0_92, %c0_93] : memref<8x8x128xf32, #tpu.memory_space<vmem>>, vector<1x8x128xf32>
    %305 = vector.shape_cast %304 : vector<1x8x128xf32> to vector<8x128xf32>
    %306 = vector.shape_cast %302 : vector<8x128xf32> to vector<1x8x128xf32>
    tpu.vector_store %arg9[%303, %c0_92, %c0_93], %306 {strides = array<i32>} : memref<8x8x128xf32, #tpu.memory_space<vmem>>, vector<1x8x128xf32>,
    %c8_i32_94 = arith.constant 8 : i32
    %c0_95 = arith.constant 0 : index
    %c0_96 = arith.constant 0 : index
    %307 = vector.load %arg7[%c0_95, %c0_96] : memref<128x128xf32, #tpu.memory_space<vmem>>, vector<128x128xf32>
    %cst_97 = arith.constant dense<0.000000e+00> : vector<8x128xf32>
    %308 = tpu.matmul %302, %307, %cst_97 {dimension_numbers = #tpu.dot_dimension_numbers<[1], [0], [0], [1], [0, 0, 1, 1], [], []>} : vector<8x128xf32>, vector<128x128xf32>, vector<8x128xf32> -> vector<8x128xf32>
    %c0_98 = arith.constant 0 : index
    %c0_99 = arith.constant 0 : index
    %309 = vector.load %arg8[%c0_98, %c0_99] : memref<1x128xf32, #tpu.memory_space<vmem>>, vector<1x128xf32>
    %310 = vector.broadcast %309 : vector<1x128xf32> to vector<8x128xf32>
    %311 = arith.addf %308, %310 : vector<8x128xf32>
    %312 = math.tanh %311 : vector<8x128xf32>
    %c0_100 = arith.constant 0 : index
    %c0_101 = arith.constant 0 : index
    %313 = vector.load %arg10[%c0_100, %c0_101] : memref<8x128xf32, #tpu.memory_space<vmem>>, vector<8x128xf32>
    tpu.vector_store %arg10[%c0_100, %c0_101], %312 {strides = array<i32>} : memref<8x128xf32, #tpu.memory_space<vmem>>, vector<8x128xf32>,
    return
  }
  func.func @transform_0(%arg0: i32) -> (i32, i32) {
    %c0_i32 = arith.constant 0 : i32
    %c0_i32_0 = arith.constant 0 : i32
    %c0_i32_1 = arith.constant 0 : i32
    return %c0_i32, %c0_i32_0 : i32, i32
  }
  func.func @transform_1(%arg0: i32) -> (i32, i32) {
    %c0_i32 = arith.constant 0 : i32
    %c0_i32_0 = arith.constant 0 : i32
    %c0_i32_1 = arith.constant 0 : i32
    return %c0_i32, %c0_i32_0 : i32, i32
  }
  func.func @transform_2(%arg0: i32) -> (i32, i32) {
    %c0_i32 = arith.constant 0 : i32
    %c0_i32_0 = arith.constant 0 : i32
    %c0_i32_1 = arith.constant 0 : i32
    return %c0_i32, %c0_i32_0 : i32, i32
  }
  func.func @transform_3(%arg0: i32) -> (i32, i32) {
    %c0_i32 = arith.constant 0 : i32
    %c0_i32_0 = arith.constant 0 : i32
    %c0_i32_1 = arith.constant 0 : i32
    return %c0_i32, %c0_i32_0 : i32, i32
  }
  func.func @transform_4(%arg0: i32) -> (i32, i32) {
    %c0_i32 = arith.constant 0 : i32
    %c0_i32_0 = arith.constant 0 : i32
    %c0_i32_1 = arith.constant 0 : i32
    return %c0_i32, %c0_i32_0 : i32, i32
  }
  func.func @transform_5(%arg0: i32) -> (i32, i32) {
    %c0_i32 = arith.constant 0 : i32
    %c0_i32_0 = arith.constant 0 : i32
    %c0_i32_1 = arith.constant 0 : i32
    return %c0_i32, %c0_i32_0 : i32, i32
  }
  func.func @transform_6(%arg0: i32) -> (i32, i32) {
    %c0_i32 = arith.constant 0 : i32
    %c0_i32_0 = arith.constant 0 : i32
    %c0_i32_1 = arith.constant 0 : i32
    return %c0_i32, %c0_i32_0 : i32, i32
  }
  func.func @transform_7(%arg0: i32) -> (i32, i32) {
    %c0_i32 = arith.constant 0 : i32
    %c0_i32_0 = arith.constant 0 : i32
    %c0_i32_1 = arith.constant 0 : i32
    return %c0_i32, %c0_i32_0 : i32, i32
  }
  func.func @transform_8(%arg0: i32) -> (i32, i32, i32) {
    %c0_i32 = arith.constant 0 : i32
    %c0_i32_0 = arith.constant 0 : i32
    %c0_i32_1 = arith.constant 0 : i32
    %c0_i32_2 = arith.constant 0 : i32
    return %c0_i32, %c0_i32_0, %c0_i32_1 : i32, i32, i32
  }
  func.func @transform_9(%arg0: i32) -> (i32, i32) {
    %c0_i32 = arith.constant 0 : i32
    %c0_i32_0 = arith.constant 0 : i32
    %c0_i32_1 = arith.constant 0 : i32
    return %c0_i32, %c0_i32_0 : i32, i32
  }
}

</mosaic_0001>

<bundles_post_ra>
// kernel: encoder_forward.1
= control target key start
LH: loop header
LB: loop body
LE: loop exit
PB: predicated region body
PF: predicated region fallthrough
CT: control target
= control target key end

     0   :  { %15 = vsyncpa [#allocation4], 0  ;;  %s4383_s0 = inlined_call_operand.vmem [shape: s32[64,1], index: 0, kind: input, shape index: {}]   ;;  %s4384_s1 = inlined_call_operand.vmem [shape: f32[64,32], index: 1, kind: input, shape index: {}]   ;;  %s4385_s2 = inlined_call_operand.hbm [shape: f32[32,384], index: 2, kind: input, shape index: {}]   ;;  %s4386_s3 = inlined_call_operand.vmem [shape: f32[1,384], index: 3, kind: input, shape index: {}]   ;;  %s4387_s4 = inlined_call_operand.hbm [shape: f32[128,384], index: 4, kind: input, shape index: {}]   ;;  %s4388_s5 = inlined_call_operand.vmem [shape: f32[1,128], index: 5, kind: input, shape index: {}]   ;;  %s4389_s6 = inlined_call_operand.vmem [shape: f32[128,128], index: 6, kind: input, shape index: {}]   ;;  %s4390_s7 = inlined_call_operand.vmem [shape: f32[1,128], index: 7, kind: input, shape index: {}]   ;;  %s4391_s8 = inlined_call_operand.vmem [shape: f32[8,8,128], index: 8, kind: output, shape index: {0}]   ;;  %s4392_s9 = inlined_call_operand.vmem [shape: f32[8,128], index: 9, kind: output, shape index: {1}]  }
   0x1   :  { %16 = vsyncpa [#allocation6], 0  ;;  %s3652_s30 = smov [#allocation3]   ;;  %s3604_s13 = scalar_lea.hbm %s4385_s2, 1536 }
   0x2   :  { %s26_s10 = sshll.u32 %s3652_s30, 4  ;;  %p3605_p0 = scmp.ne.s32.totalorder %s4385_s2, %s3604_s13  ;;  %s27_s10 = int_to_ptr.vmem [resolvable:$true] %s26_s10 }
   0x3   :  { %p3608_p1 = scmp.lt.u32.totalorder %s3604_s13, %s4385_s2 }
   0x5   :  { %p3610_p2 = pnand %p3608_p1, %p3605_p0 }
   0x7   :  { %3613 = shalt.err (!%p3610_p2)
}
   0x8   :  { %s3614_s18 = scalar_lea.vmem %s27_s10, 1536  ;;  %p3619_p4 = scmp.lt.s32.totalorder %s27_s10, %s27_s10 }
   0x9   :  { %p3615_p3 = scmp.ne.s32.totalorder %s27_s10, %s3614_s18  ;;  %p3620_p5 = scmp.lt.s32.totalorder %s3614_s18, %s3614_s18 }
   0xb   :  { %p3621_p6 = por %p3620_p5, %p3619_p4 }
   0xd   :  { %p3622_p7 = pnand %p3621_p6, %p3615_p3 }
   0xf   :  { %3625 = shalt.err (!%p3622_p7)
}
  0x10   :  { %s3653_s19 = smov 384   ;;  %s3654_s20 = smov 24  }
  0x11   :  { %32 = dma.hbm_to_vmem [thread:$0]  %s4385_s2, 1536, %s27_s10, [#allocation4], %s3653_s19, %s3653_s19, %s3654_s20  }
  0x12   :  { %s3655_s23 = smov [#allocation5]   ;;  %s3626_s27 = scalar_lea.hbm %s4387_s4, 6144 }
  0x13   :  { %s40_s24 = sshll.u32 %s3655_s23, 4  ;;  %p3627_p8 = scmp.ne.s32.totalorder %s4387_s4, %s3626_s27  ;;  %s41_s24 = int_to_ptr.vmem [resolvable:$true] %s40_s24 }
  0x14   :  { %p3630_p9 = scmp.lt.u32.totalorder %s3626_s27, %s4387_s4 }
  0x16   :  { %p3632_p10 = pnand %p3630_p9, %p3627_p8 }
  0x18   :  { %3635 = shalt.err (!%p3632_p10)
}
  0x19   :  { %s3636_s12 = scalar_lea.vmem %s41_s24, 6144  ;;  %p3641_p12 = scmp.lt.s32.totalorder %s41_s24, %s41_s24 }
  0x1a   :  { %p3637_p11 = scmp.ne.s32.totalorder %s41_s24, %s3636_s12  ;;  %p3642_p13 = scmp.lt.s32.totalorder %s3636_s12, %s3636_s12 }
  0x1c   :  { %p3643_p0 = por %p3642_p13, %p3641_p12 }
  0x1e   :  { %p3644_p1 = pnand %p3643_p0, %p3637_p11 }
  0x20   :  { %3647 = shalt.err (!%p3644_p1)
}
  0x21   :  { %46 = dma.hbm_to_vmem [thread:$0]  %s4387_s4, 6144, %s41_s24, [#allocation6], %s3653_s19, %s3653_s19, %s3654_s20  }
  0x22   :  { %3648 = dma.done.wait [#allocation4], 1536  }
  0x23   :  { %3649 = vsyncadd [#allocation4], 4294965760 }
  0x24   :  { %3650 = dma.done.wait [#allocation6], 6144  }
  0x25   :  { %3651 = vsyncadd [#allocation6], 4294961152  ;;  %v3656_v0 = vmov 0   ;;  %v3657_v1 = vmov 0.0   ;;  %v61_v2 = vld [vmem:[%s4383_s0 + $0x10] sm:$0xff]  ;;  %v59_v3 = vld [vmem:[%s4383_s0] sm:$0xff]  ;;  %v67_v37 = vlaneseq }
  0x26   :  { %3520 = vset.pattern.permute.xlu1 %v3656_v0  ;;  %3519 = vset.pattern.permute.xlu0 %v3656_v0  ;;  %v62_v4 = vld [vmem:[%s4383_s0 + $0x18] sm:$0xff]  ;;  %v60_v5 = vld [vmem:[%s4383_s0 + $0x8] sm:$0xff]  ;;  %v109_v6 = vld [vmem:[%s4384_s1] sm:$0xff]  ;;  %vm117_vm0 = vcmask 523264   ;;  %v3658_v61 = vmov 0.0|0.0   ;;  %vm276_vm9 = vcmask 261120  }
  0x27   :  { %365 = vmatprep.mubr.f32.mxu1 %v3657_v1  ;;  %76 = vperm.xlu1 %3520, %v61_v2   ;;  %v110_v7 = vld [vmem:[%s4384_s1 + $0x8] sm:$0xff]  ;;  %v111_v8 = vld [vmem:[%s4384_s1 + $0x10] sm:$0xff]  ;;  %v112_v9 = vld [vmem:[%s4384_s1 + $0x18] sm:$0xff]  ;;  %v68_v38 = vand.u32 127, %v67_v37  ;;  %vm3659_vm10 = vmmov 0  }
  0x28   :  { %70 = vperm.xlu0 %3519, %v59_v3   ;;  %v2975_v10 = vpack.c.bf16 %v110_v7, %v109_v6  ;;  %v2979_v11 = vpack.c.bf16 %v112_v9, %v111_v8  ;;  %v113_v12 = vld [vmem:[%s4384_s1 + $0x20] sm:$0xff]  ;;  %v114_v13 = vld [vmem:[%s4384_s1 + $0x28] sm:$0xff]  ;;  %v115_v17 = vld [vmem:[%s4384_s1 + $0x30] sm:$0xff] }
  0x29   :  { %v64_v14 = vld [vmem:[%s4383_s0 + $0x28] sm:$0xff]  ;;  %v63_v15 = vld [vmem:[%s4383_s0 + $0x20] sm:$0xff]  ;;  %v2983_v16 = vpack.c.bf16 %v114_v13, %v113_v12  ;;  %v116_v18 = vld [vmem:[%s4384_s1 + $0x38] sm:$0xff] }
  0x2a   :  { %2976 = vmatprep.subr.bf16.mxu0 %v2975_v10  ;;  %v66_v19 = vld [vmem:[%s4383_s0 + $0x38] sm:$0xff]  ;;  %v65_v20 = vld [vmem:[%s4383_s0 + $0x30] sm:$0xff]  ;;  %v2987_v21 = vpack.c.bf16 %v116_v18, %v115_v17  ;;  %v248_v22 = vld [vmem:[#allocation3 + $0x8] sm:$0xff] }
  0x2b   :  { %79 = vperm.xlu1 %3520, %v62_v4   ;;  %2978 = vmatpush3.bf16.msra.mxu0 %v2975_v10  ;;  %v251_v23 = vld [vmem:[#allocation3 + $0x20] sm:$0xff]  ;;  %v250_v26 = vld [vmem:[#allocation3 + $0x18] sm:$0xff]  ;;  %v249_v27 = vld [vmem:[#allocation3 + $0x10] sm:$0xff] }
  0x2c   :  { %73 = vperm.xlu0 %3519, %v60_v5   ;;  %2980 = vmatprep.subr.bf16.mxu0 %v2979_v11  ;;  %v247_v24 = vld [vmem:[#allocation3] sm:$0xff]  ;;  %v2991_v25 = vpack.c.bf16 %v251_v23, %v248_v22  ;;  %v252_v28 = vld [vmem:[#allocation3 + $0x28] sm:$0xff]  ;;  %v254_v31 = vld [vmem:[#allocation3 + $0x38] sm:$0xff] }
  0x2d   :  { %v2993_v29 = vpack.c.bf16 %v250_v26, %v247_v24  ;;  %v2999_v30 = vpack.c.bf16 %v252_v28, %v249_v27  ;;  %v257_v32 = vld [vmem:[#allocation3 + $0x50] sm:$0xff]  ;;  %v256_v35 = vld [vmem:[#allocation3 + $0x48] sm:$0xff]  ;;  %v255_v42 = vld [vmem:[#allocation3 + $0x40] sm:$0xff] }
  0x2e   :  { %v253_v33 = vld [vmem:[#allocation3 + $0x30] sm:$0xff]  ;;  %2992 = vmatprep.subr.bf16.mxu1 %v2991_v25  ;;  %v2995_v34 = vpack.c.bf16 %v257_v32, %v254_v31  ;;  %v258_v43 = vld [vmem:[#allocation3 + $0x58] sm:$0xff]  ;;  %v554_v58 = vld [vmem:[#allocation5 + $0x8] sm:$0xff] }
  0x2f   :  { %85 = vperm.xlu1 %3520, %v64_v14   ;;  %2982 = vmatpush3.bf16.msra.mxu0 %v2979_v11  ;;  %v2997_v36 = vpack.c.bf16 %v256_v35, %v253_v33  ;;  %v3003_v47 = vpack.c.bf16 %v258_v43, %v255_v42  ;;  %v557_v59 = vld [vmem:[#allocation5 + $0x20] sm:$0xff]  ;;  %v556_v63 = vld [vmem:[#allocation5 + $0x18] sm:$0xff]  ;;  %v563_v2 = vld [vmem:[#allocation5 + $0x50] sm:$0xff] }
  0x30   :  { %82 = vperm.xlu0 %3519, %v63_v15   ;;  %2984 = vmatprep.subr.bf16.mxu0 %v2983_v16  ;;  %v3800_v60 = vpack.c.bf16 %v557_v59, %v554_v58  ;;  %v553_v62 = vld [vmem:[#allocation5] sm:$0xff]  ;;  %v560_v0 = vld [vmem:[#allocation5 + $0x38] sm:$0xff]  ;;  %v555_v3 = vld [vmem:[#allocation5 + $0x10] sm:$0xff] }
  0x31   :  { %2994 = vmatpush1.bf16.msra.mxu1 %v2993_v29  ;;  %v558_v4 = vld [vmem:[#allocation5 + $0x28] sm:$0xff]  ;;  %v3804_v5 = vpack.c.bf16 %v556_v63, %v553_v62  ;;  %v3806_v7 = vpack.c.bf16 %v563_v2, %v560_v0  ;;  %v559_v8 = vld [vmem:[#allocation5 + $0x30] sm:$0xff]  ;;  %v569_v12 = vld [vmem:[#allocation5 + $0x80] sm:$0xff] }
  0x32   :  { %2996 = vmatprep.subr.bf16.mxu1 %v2995_v34  ;;  %v562_v9 = vld [vmem:[#allocation5 + $0x48] sm:$0xff]  ;;  %v3808_v13 = vpack.c.bf16 %v558_v4, %v555_v3  ;;  %v565_v17 = vld [vmem:[#allocation5 + $0x60] sm:$0xff]  ;;  %v568_v18 = vld [vmem:[#allocation5 + $0x78] sm:$0xff] }
  0x33   :  { %91 = vperm.xlu1 %3520, %v66_v19   ;;  %2986 = vmatpush3.bf16.msra.mxu0 %v2983_v16  ;;  %v566_v11 = vld [vmem:[#allocation5 + $0x68] sm:$0xff]  ;;  %v3814_v14 = vpack.c.bf16 %v562_v9, %v559_v8  ;;  %v561_v22 = vld [vmem:[#allocation5 + $0x40] sm:$0xff]  ;;  %v564_v23 = vld [vmem:[#allocation5 + $0x58] sm:$0xff]  ;;  %v3825_v24 = vpack.c.bf16 %v568_v18, %v565_v17 }
  0x34   :  { %88 = vperm.xlu0 %3519, %v65_v20   ;;  %2988 = vmatprep.subr.bf16.mxu0 %v2987_v21  ;;  %v3818_v16 = vpack.c.bf16 %v569_v12, %v566_v11  ;;  %v572_v20 = vld [vmem:[#allocation5 + $0x98] sm:$0xff]  ;;  %v571_v27 = vld [vmem:[#allocation5 + $0x90] sm:$0xff]  ;;  %v574_v28 = vld [vmem:[#allocation5 + $0xa8] sm:$0xff]  ;;  %v3832_v32 = vpack.c.bf16 %v564_v23, %v561_v22 }
  0x35   :  { %2998 = vmatpush1.bf16.msra.mxu1 %v2997_v36  ;;  %v581_v31 = vld [vmem:[#allocation5 + $0xe0] sm:$0xff]  ;;  %v3838_v33 = vpack.c.bf16 %v574_v28, %v571_v27  ;;  %v567_v34 = vld [vmem:[#allocation5 + $0x70] sm:$0xff]  ;;  %v570_v35 = vld [vmem:[#allocation5 + $0x88] sm:$0xff] }
  0x36   :  { %3008 = vmatprep.subr.bf16.mxu1 %v3800_v60  ;;  %v584_v42 = vld [vmem:[#allocation5 + $0xf8] sm:$0xff]  ;;  %v587_v43 = vld [vmem:[#allocation5 + $0x110] sm:$0xff]  ;;  %v589_v58 = vld [vmem:[#allocation5 + $0x120] sm:$0xff] }
  0x37   :  { %2990 = vmatpush3.bf16.msra.mxu0 %v2987_v21  ;;  %v575_v21 = vld [vmem:[#allocation5 + $0xb0] sm:$0xff]  ;;  %v592_v59 = vld [vmem:[#allocation5 + $0x138] sm:$0xff]  ;;  %v585_v3 = vld [vmem:[#allocation5 + $0x100] sm:$0xff] }
  0x38   :  { %3000 = vmatprep.subr.bf16.mxu0 %v2999_v30  ;;  %v3829_v26 = vpack.c.bf16 %v575_v21, %v572_v20  ;;  %v596_v62 = vld [vmem:[#allocation5 + $0x158] sm:$0xff]  ;;  %v599_v63 = vld [vmem:[#allocation5 + $0x170] sm:$0xff]  ;;  %v3881_v2 = vpack.c.bf16 %v592_v59, %v589_v58  ;;  %v598_v9 = vld [vmem:[#allocation5 + $0x168] sm:$0xff]  ;;  %v262_v21 = vshrl.u32 %v67_v37, 7 }
  0x39   :  { %v588_v4 = vld [vmem:[#allocation5 + $0x118] sm:$0xff]  ;;  %v595_v8 = vld [vmem:[#allocation5 + $0x150] sm:$0xff]  ;;  %v597_v18 = vld [vmem:[#allocation5 + $0x160] sm:$0xff] }
  0x3a   :  { %v3893_v11 = vpack.c.bf16 %v598_v9, %v595_v8  ;;  %v591_v12 = vld [vmem:[#allocation5 + $0x130] sm:$0xff]  ;;  %v271_v22 = vsub.s32 2, %v262_v21  ;;  %v259_v23 = vld [vmem:[%s4386_s3] sm:$0x7] }
  0xa6   :  { %v77_v39 = vpop.permute.xlu1 %76 }
  0xa7   :  { %v71_v40 = vpop.permute.xlu0 %70  ;;  %vm95_vm2 = vcmp.eq.s32.totalorder %v77_v39, %v68_v38  ;;  %v577_v39 = vld [vmem:[#allocation5 + $0xc0] sm:$0xff] }
  0xa8   :  { %vm93_vm1 = vcmp.eq.s32.totalorder %v71_v40, %v68_v38  ;;  %v103_v46 = vsel %vm95_vm2, 1.0, %v3657_v1  ;;  %v580_v40 = vld [vmem:[#allocation5 + $0xd8] sm:$0xff] }
  0xa9   :  { %v101_v41 = vsel %vm93_vm1, 1.0, %v3657_v1 }
  0xaa   :  { %2628 = vmatprep.mubr.msk.f32.mxu0 %vm117_vm0, %v101_v41  ;;  %v80_v44 = vpop.permute.xlu1 %79 }
  0xab   :  { %v74_v45 = vpop.permute.xlu0 %73  ;;  %vm96_vm3 = vcmp.eq.s32.totalorder %v80_v44, %v68_v38  ;;  %v3849_v44 = vpack.c.bf16 %v570_v35, %v567_v34 }
  0xac   :  { %vm94_vm4 = vcmp.eq.s32.totalorder %v74_v45, %v68_v38  ;;  %v104_v49 = vsel %vm96_vm3, 1.0, %v3657_v1  ;;  %v3854_v45 = vpack.c.bf16 %v580_v40, %v577_v39 }
  0xad   :  { %v102_v48 = vsel %vm94_vm4, 1.0, %v3657_v1 }
  0xae   :  { %2629 = vmatmul.mubr.msk.f32.vlgmr.msra.gmra.mrb[0].mxu0 %vm117_vm0, %v102_v48  ;;  %v86_v50 = vpop.permute.xlu1 %85  ;;  %v3858_v48 = vpack.c.bf16 %v587_v43, %v584_v42 }
  0xaf   :  { %v83_v51 = vpop.permute.xlu0 %82  ;;  %2631 = vmatprep.mubr.msk.f32.mxu0 %vm117_vm0, %v103_v46  ;;  %3002 = vmatpush3.bf16.msra.mxu0 %v2999_v30  ;;  %vm98_vm6 = vcmp.eq.s32.totalorder %v86_v50, %v68_v38  ;;  %v578_v30 = vld [vmem:[#allocation5 + $0xc8] sm:$0xff]  ;;  %v573_v46 = vld [vmem:[#allocation5 + $0xa0] sm:$0xff] }
  0xb0   :  { %vm97_vm5 = vcmp.eq.s32.totalorder %v83_v51, %v68_v38  ;;  %3004 = vmatprep.subr.bf16.mxu0 %v3003_v47  ;;  %v106_v55 = vsel %vm98_vm6, 1.0, %v3657_v1  ;;  %v586_v50 = vld [vmem:[#allocation5 + $0x108] sm:$0xff] }
  0xb1   :  { %v105_v52 = vsel %vm97_vm5, 1.0, %v3657_v1  ;;  %v590_v51 = vld [vmem:[#allocation5 + $0x128] sm:$0xff] }
  0xb2   :  { %2632 = vmatmul.mubr.msk.f32.gmra.mrb[2].mxu0 %vm117_vm0, %v104_v49  ;;  %v92_v53 = vpop.permute.xlu1 %91  ;;  %v583_v49 = vld [vmem:[#allocation5 + $0xf0] sm:$0xff] }
  0xb3   :  { %2634 = vmatprep.mubr.msk.f32.mxu0 %vm117_vm0, %v105_v52  ;;  %v89_v54 = vpop.permute.xlu0 %88  ;;  %3006 = vmatpush3.bf16.msra.mxu0 %v3003_v47  ;;  %vm100_vm8 = vcmp.eq.s32.totalorder %v92_v53, %v68_v38  ;;  %v576_v47 = vld [vmem:[#allocation5 + $0xb8] sm:$0xff]  ;;  %v593_v52 = vld [vmem:[#allocation5 + $0x140] sm:$0xff] }
  0xb4   :  { %vm99_vm7 = vcmp.eq.s32.totalorder %v89_v54, %v68_v38  ;;  %v108_v57 = vsel %vm100_vm8, 1.0, %v3657_v1  ;;  %3039 = vmatprep.subr.bf16.mxu0 %v3658_v61  ;;  %v3844_v38 = vpack.c.bf16 %v581_v31, %v578_v30  ;;  %v3865_v53 = vpack.c.bf16 %v576_v47, %v573_v46 }
  0xb5   :  { %v107_v56 = vsel %vm99_vm7, 1.0, %v3657_v1  ;;  %v3869_v54 = vpack.c.bf16 %v586_v50, %v583_v49  ;;  %v263_v49 = vsub.s32 0, %v262_v21  ;;  %v267_v50 = vsub.s32 1, %v262_v21 }
  0xb6   :  { %2635 = vmatmul.mubr.msk.f32.gmra.mrb[4].mxu0 %vm117_vm0, %v106_v55  ;;  %v579_v55 = vld [vmem:[#allocation5 + $0xd0] sm:$0xff] }
  0xb7   :  { %2637 = vmatprep.mubr.msk.f32.mxu0 %vm117_vm0, %v107_v56  ;;  %v582_v56 = vld [vmem:[#allocation5 + $0xe8] sm:$0xff] }
  0xb8   :  { %v3877_v0 = vpack.c.bf16 %v582_v56, %v579_v55  ;;  %v3969_v55 = vrot.slane %v259_v23, %v267_v50 }
  0xba   :  { %2638 = vmatmul.mubr.msk.f32.gmra.mrb[6].mxu0 %vm117_vm0, %v108_v57  ;;  %v3872_v57 = vpack.c.bf16 %v593_v52, %v590_v51  ;;  %v3967_v51 = vrot.slane %v259_v23, %v263_v49 }
 0x181   :  { %v2630_v6 = vpop.f32.mrb[0].mxu0 }
 0x182   :  { %v208_v10 = vpop.f32.mrb[1].mxu0 }
 0x183   :  { %2390 = vmatmul.mubr.msk.f32.vlgmr.msra.gmra.mrb[0].mxu1 %vm276_vm9, %v208_v10  ;;  %2648 = vmatprep.mubr.msk.f32.mxu0 %vm276_vm9, %v208_v10  ;;  %v3889_v10 = vpack.c.bf16 %v588_v4, %v585_v3 }
 0x184   :  { %3010 = vmatpush1.bf16.msra.mxu1 %v3804_v5  ;;  %2649 = vmatmul.mubr.msk.f32.vlgmr.msra.gmra.mrb[8].mxu0 %vm276_vm9, %v2630_v6 }
 0x185   :  { %v2633_v15 = vpop.f32.mrb[2].mxu0  ;;  %371 = vmatprep.mubr.f32.mxu1 %v3657_v1  ;;  %3012 = vmatprep.subr.bf16.mxu1 %v3806_v7 }
 0x186   :  { %v218_v19 = vpop.f32.mrb[3].mxu0  ;;  %3041 = vmatpush3.bf16.msra.mxu0 %v3808_v13 }
 0x187   :  { %2391 = vmatmul.mubr.msk.f32.gmra.mrb[2].mxu1 %vm276_vm9, %v2630_v6  ;;  %2651 = vmatprep.mubr.msk.f32.mxu0 %vm276_vm9, %v218_v19  ;;  %v3884_v6 = vpack.c.bf16 %v599_v63, %v596_v62 }
 0x188   :  { %3014 = vmatpush1.bf16.msra.mxu1 %v3814_v14  ;;  %2652 = vmatmul.mubr.msk.f32.gmra.mrb[10].mxu0 %vm276_vm9, %v2633_v15 }
 0x189   :  { %v2636_v25 = vpop.f32.mrb[4].mxu0  ;;  %377 = vmatprep.mubr.f32.mxu1 %v3657_v1  ;;  %3016 = vmatprep.subr.bf16.mxu1 %v3818_v16 }
 0x18a   :  { %v228_v29 = vpop.f32.mrb[5].mxu0  ;;  %3042 = vmatprep.subr.bf16.mxu0 %v3658_v61 }
 0x18b   :  { %2392 = vmatmul.mubr.msk.f32.gmra.mrb[4].mxu1 %vm276_vm9, %v218_v19  ;;  %2654 = vmatprep.mubr.msk.f32.mxu0 %vm276_vm9, %v228_v29  ;;  %v600_v19 = vld [vmem:[#allocation5 + $0x178] sm:$0xff] }
 0x18c   :  { %3018 = vmatpush1.bf16.msra.mxu1 %v3825_v24  ;;  %2655 = vmatmul.mubr.msk.f32.gmra.mrb[12].mxu0 %vm276_vm9, %v2636_v25  ;;  %v3908_v20 = vpack.c.bf16 %v600_v19, %v597_v18 }
 0x18d   :  { %v3840_v36 = vpop.f32.mrb[6].mxu0  ;;  %383 = vmatprep.mubr.f32.mxu1 %v3657_v1  ;;  %3020 = vmatprep.subr.bf16.mxu1 %v3829_v26 }
 0x18e   :  { %v238_v41 = vpop.f32.mrb[7].mxu0  ;;  %3044 = vmatpush3.bf16.msra.mxu0 %v3832_v32 }
 0x18f   :  { %2393 = vmatmul.mubr.msk.f32.gmra.mrb[6].mxu1 %vm276_vm9, %v2633_v15  ;;  %2657 = vmatprep.mubr.msk.f32.mxu0 %vm276_vm9, %v238_v41  ;;  %v594_v15 = vld [vmem:[#allocation5 + $0x148] sm:$0xff] }
 0x190   :  { %3022 = vmatpush1.bf16.msra.mxu1 %v3838_v33  ;;  %2658 = vmatmul.mubr.msk.f32.gmra.mrb[14].mxu0 %vm276_vm9, %v3840_v36  ;;  %v3900_v17 = vpack.c.bf16 %v594_v15, %v591_v12  ;;  %v3976_v15 = vld [vmem:[%s4388_s5] ss:$0 sm:$0xff] }
 0x191   :  { %389 = vmatprep.mubr.f32.mxu1 %v3657_v1  ;;  %3024 = vmatprep.subr.bf16.mxu1 %v3844_v38 }
 0x192   :  { %3045 = vmatprep.subr.bf16.mxu0 %v3658_v61  ;;  %2692 = vmatprep.mubr.msk.f32.mxu0 %vm3659_vm10, %v3657_v1 }
 0x193   :  { %2394 = vmatmul.mubr.msk.f32.gmra.mrb[8].mxu1 %vm276_vm9, %v228_v29  ;;  %3047 = vmatpush3.bf16.msra.mxu0 %v3849_v44 }
 0x194   :  { %3026 = vmatpush1.bf16.msra.mxu1 %v3854_v45  ;;  %395 = vmatprep.mubr.f32.mxu1 %v3657_v1 }
 0x195   :  { %3028 = vmatprep.subr.bf16.mxu1 %v3858_v48  ;;  %3048 = vmatprep.subr.bf16.mxu0 %v3658_v61 }
 0x197   :  { %2395 = vmatmul.mubr.msk.f32.gmra.mrb[10].mxu1 %vm276_vm9, %v2636_v25  ;;  %3050 = vmatpush3.bf16.msra.mxu0 %v3865_v53  ;;  %v272_v25 = vrot.slane %v259_v23, %v271_v22 }
 0x198   :  { %3030 = vmatpush1.bf16.msra.mxu1 %v3869_v54  ;;  %401 = vmatprep.mubr.f32.mxu1 %v3657_v1 }
 0x199   :  { %3032 = vmatprep.subr.bf16.mxu1 %v3872_v57  ;;  %3051 = vmatprep.subr.bf16.mxu0 %v3658_v61 }
 0x19b   :  { %2396 = vmatmul.mubr.msk.f32.gmra.mrb[12].mxu1 %vm276_vm9, %v238_v41  ;;  %3053 = vmatpush3.bf16.msra.mxu0 %v3877_v0 }
 0x19c   :  { %3034 = vmatpush1.bf16.msra.mxu1 %v3881_v2  ;;  %407 = vmatprep.mubr.f32.mxu1 %v3657_v1 }
 0x19d   :  { %3036 = vmatprep.subr.bf16.mxu1 %v3884_v6  ;;  %3054 = vmatprep.subr.bf16.mxu0 %v3658_v61 }
 0x19f   :  { %2397 = vmatmul.mubr.msk.f32.gmra.mrb[14].mxu1 %vm276_vm9, %v3840_v36  ;;  %3056 = vmatpush3.bf16.msra.mxu0 %v3889_v10 }
 0x1a0   :  { %3038 = vmatpush1.bf16.msra.mxu1 %v3893_v11  ;;  %665 = vmatprep.mubr.f32.mxu1 %v3657_v1 }
 0x1a1   :  { %3057 = vmatprep.subr.bf16.mxu0 %v3658_v61  ;;  %3064 = vmatprep.subr.bf16.mxu1 %v3800_v60 }
 0x1a3   :  { %666 = vmatmul.mubr.f32.vlgmr.msra.gmra.mrb[0].mxu1 %v3657_v1  ;;  %3059 = vmatpush3.bf16.msra.mxu0 %v3900_v17 }
 0x1a4   :  { %3060 = vmatprep.subr.bf16.mxu0 %v3658_v61  ;;  %3066 = vmatpush1.bf16.msra.mxu1 %v3804_v5 }
 0x1a5   :  { %3068 = vmatprep.subr.bf16.mxu1 %v3806_v7  ;;  %880 = vmatprep.mubr.f32.mxu1 %v3657_v1 }
 0x1a7   :  { %3062 = vmatpush3.bf16.msra.mxu0 %v3908_v20 }
 0x1a8   :  { %3095 = vmatprep.subr.bf16.mxu0 %v3658_v61  ;;  %3070 = vmatpush1.bf16.msra.mxu1 %v3814_v14 }
 0x1a9   :  { %3072 = vmatprep.subr.bf16.mxu1 %v3818_v16 }
 0x1aa   :  { %2693 = vmatmul.mubr.f32.vlgmr.msra.gmra.mrb[16].mxu0 %v3657_v1 }
 0x1ab   :  { %3097 = vmatpush3.bf16.msra.mxu0 %v3808_v13  ;;  %2727 = vmatprep.mubr.msk.f32.mxu0 %vm3659_vm10, %v3657_v1 }
 0x1ac   :  { %3098 = vmatprep.subr.bf16.mxu0 %v3658_v61  ;;  %3074 = vmatpush1.bf16.msra.mxu1 %v3825_v24 }
 0x1ad   :  { %3076 = vmatprep.subr.bf16.mxu1 %v3829_v26 }
 0x1af   :  { %3100 = vmatpush3.bf16.msra.mxu0 %v3832_v32 }
 0x1b0   :  { %3101 = vmatprep.subr.bf16.mxu0 %v3658_v61  ;;  %3078 = vmatpush1.bf16.msra.mxu1 %v3838_v33 }
 0x1b1   :  { %3080 = vmatprep.subr.bf16.mxu1 %v3844_v38 }
 0x1b3   :  { %3103 = vmatpush3.bf16.msra.mxu0 %v3849_v44 }
 0x1b4   :  { %3104 = vmatprep.subr.bf16.mxu0 %v3658_v61  ;;  %3082 = vmatpush1.bf16.msra.mxu1 %v3854_v45 }
 0x1b5   :  { %3084 = vmatprep.subr.bf16.mxu1 %v3858_v48 }
 0x1b7   :  { %3106 = vmatpush3.bf16.msra.mxu0 %v3865_v53 }
 0x1b8   :  { %3107 = vmatprep.subr.bf16.mxu0 %v3658_v61  ;;  %3086 = vmatpush1.bf16.msra.mxu1 %v3869_v54 }
 0x1b9   :  { %3088 = vmatprep.subr.bf16.mxu1 %v3872_v57 }
 0x1bb   :  { %3109 = vmatpush3.bf16.msra.mxu0 %v3877_v0 }
 0x1bc   :  { %3110 = vmatprep.subr.bf16.mxu0 %v3658_v61  ;;  %3090 = vmatpush1.bf16.msra.mxu1 %v3881_v2 }
 0x1bd   :  { %3092 = vmatprep.subr.bf16.mxu1 %v3884_v6 }
 0x1bf   :  { %3112 = vmatpush3.bf16.msra.mxu0 %v3889_v10 }
 0x1c0   :  { %3113 = vmatprep.subr.bf16.mxu0 %v3658_v61  ;;  %3094 = vmatpush1.bf16.msra.mxu1 %v3893_v11 }
 0x1c1   :  { %3120 = vmatprep.subr.bf16.mxu1 %v3800_v60 }
 0x1c3   :  { %3115 = vmatpush3.bf16.msra.mxu0 %v3900_v17 }
 0x1c4   :  { %3116 = vmatprep.subr.bf16.mxu0 %v3658_v61 }
 0x1c7   :  { %3118 = vmatpush3.bf16.msra.mxu0 %v3908_v20 }
 0x1c8   :  { %3151 = vmatprep.subr.bf16.mxu0 %v3658_v61 }
 0x257   :  { %v2650_v27 = vpop.f32.mrb[8].mxu0 }
 0x258   :  { %v3953_v28 = vadd.f32 %v2650_v27, %v272_v25  ;;  %v480_v29 = vpop.f32.mrb[9].mxu0 }
 0x259   :  { %v481_v30 = vadd.f32 %v480_v29, %v272_v25 }
 0x25b   :  { %v2653_v31 = vpop.f32.mrb[10].mxu0 }
 0x25c   :  { %v3955_v34 = vadd.f32 %v2653_v31, %v272_v25  ;;  %v490_v35 = vpop.f32.mrb[11].mxu0 }
 0x25d   :  { %v3957_v36 = vadd.f32 %v490_v35, %v272_v25 }
 0x25f   :  { %v2656_v39 = vpop.f32.mrb[12].mxu0 }
 0x260   :  { %v3959_v40 = vadd.f32 %v2656_v39, %v272_v25  ;;  %v500_v37 = vpop.f32.mrb[13].mxu0 }
 0x261   :  { %v3961_v41 = vadd.f32 %v500_v37, %v272_v25 }
 0x263   :  { %v2659_v42 = vpop.f32.mrb[14].mxu0 }
 0x264   :  { %v3963_v43 = vadd.f32 %v2659_v42, %v272_v25  ;;  %v510_v46 = vpop.f32.mrb[15].mxu0 }
 0x265   :  { %v3965_v47 = vadd.f32 %v510_v46, %v272_v25 }
 0x276   :  { %v667_v52 = vpop.f32.mrb[0].mxu1 }
 0x277   :  { %v3479_v56 = vadd.f32 %v667_v52, %v3967_v51  ;;  %v669_v58 = vpop.f32.mrb[1].mxu1 }
 0x278   :  { %v3480_v62 = vadd.f32 %v669_v58, %v3969_v55 }
 0x279   :  { %v2407_v59 = vmul.f32 -1.442695, %v3479_v56 }
 0x27a   :  { %v2408_v3 = vmul.f32 -1.442695, %v3480_v62 }
 0x27b   :  { %3521 = vpow2.f32 %v2407_v59 }
 0x27c   :  { %3523 = vpow2.f32 %v2408_v3 }
 0x27d   :  { %v738_v63 = vpop.f32.mrb[16].mxu0 }
 0x27e   :  { %v2694_v4 = vpop.f32.mrb[17].mxu0  ;;  %v756_v19 = vadd.f32 %v3976_v15, %v738_v63 }
 0x285   :  { %v3522_v8 = vpop.eup %3521 }
 0x286   :  { %v746_v9 = vadd.f32 1.0, %v3522_v8  ;;  %v3524_v12 = vpop.eup %3523 }
 0x287   :  { %v753_v18 = vadd.f32 1.0, %v3524_v12 }
 0x288   :  { %3525 = vrcp.f32 %v746_v9 }
 0x289   :  { %3527 = vrcp.f32 %v753_v18 }
 0x292   :  { %v3526_v21 = vpop.eup %3525 }
 0x293   :  { %v757_v22 = vmul.f32 %v3526_v21, %v756_v19  ;;  %v3528_v25 = vpop.eup %3527 }
 0x294   :  { %v760_v27 = vsub.f32 1.0, %v3528_v25  ;;  %v762_v35 = vmul.f32 0.0, %v3528_v25 }
 0x295   :  { %v758_v23 = vadd.f32 %v757_v22, %v481_v30 }
 0x297   :  { %3529 = vtanh.f32 %v758_v23 }
 0x2a1   :  { %v3530_v29 = vpop.eup %3529 }
 0x2a2   :  { %v761_v31 = vmul.f32 %v3530_v29, %v760_v27  ;;  %v1416_v29 = vld [vmem:[#allocation5] sm:$0xff] }
 0x2a4   :  { %v3979_v39 = vadd.f32 %v762_v35, %v761_v31  ;;  %v1419_v31 = vld [vmem:[#allocation5 + $0x18] sm:$0xff] }
 0x2a5   :  { %v4089_v35 = vpack.c.bf16 %v1419_v31, %v1416_v29  ;;  %v1461_v29 = vld [vmem:[#allocation5 + $0x168] sm:$0xff]  ;;  %v1460_v31 = vld [vmem:[#allocation5 + $0x160] sm:$0xff] }
 0x2a6   :  { %764 = vst [vmem:[%s4391_s8] sm:$0xff] %v3979_v39  ;;  %881 = vmatmul.mubr.f32.vlgmr.msra.gmra.mrb[2].mxu1 %v3979_v39  ;;  %2728 = vmatmul.mubr.f32.vlgmr.msra.gmra.mrb[18].mxu0 %v3979_v39 }
 0x2a7   :  { %3122 = vmatpush1.bf16.msra.mxu1 %v3804_v5  ;;  %3153 = vmatpush3.bf16.msra.mxu0 %v3808_v13 }
 0x2a8   :  { %3124 = vmatprep.subr.bf16.mxu1 %v3806_v7  ;;  %3154 = vmatprep.subr.bf16.mxu0 %v3658_v61 }
 0x2a9   :  { %1096 = vmatprep.mubr.f32.mxu1 %v3657_v1  ;;  %2762 = vmatprep.mubr.msk.f32.mxu0 %vm3659_vm10, %v3657_v1 }
 0x2ab   :  { %3126 = vmatpush1.bf16.msra.mxu1 %v3814_v14  ;;  %3156 = vmatpush3.bf16.msra.mxu0 %v3832_v32 }
 0x2ac   :  { %3128 = vmatprep.subr.bf16.mxu1 %v3818_v16  ;;  %3157 = vmatprep.subr.bf16.mxu0 %v3658_v61 }
 0x2af   :  { %3130 = vmatpush1.bf16.msra.mxu1 %v3825_v24  ;;  %3159 = vmatpush3.bf16.msra.mxu0 %v3849_v44 }
 0x2b0   :  { %3132 = vmatprep.subr.bf16.mxu1 %v3829_v26  ;;  %3160 = vmatprep.subr.bf16.mxu0 %v3658_v61 }
 0x2b3   :  { %3134 = vmatpush1.bf16.msra.mxu1 %v3838_v33  ;;  %3162 = vmatpush3.bf16.msra.mxu0 %v3865_v53 }
 0x2b4   :  { %3136 = vmatprep.subr.bf16.mxu1 %v3844_v38  ;;  %3163 = vmatprep.subr.bf16.mxu0 %v3658_v61 }
 0x2b7   :  { %3138 = vmatpush1.bf16.msra.mxu1 %v3854_v45  ;;  %3165 = vmatpush3.bf16.msra.mxu0 %v3877_v0 }
 0x2b8   :  { %3140 = vmatprep.subr.bf16.mxu1 %v3858_v48  ;;  %3166 = vmatprep.subr.bf16.mxu0 %v3658_v61 }
 0x2bb   :  { %3142 = vmatpush1.bf16.msra.mxu1 %v3869_v54  ;;  %3168 = vmatpush3.bf16.msra.mxu0 %v3889_v10 }
 0x2bc   :  { %3144 = vmatprep.subr.bf16.mxu1 %v3872_v57  ;;  %3169 = vmatprep.subr.bf16.mxu0 %v3658_v61 }
 0x2bf   :  { %3146 = vmatpush1.bf16.msra.mxu1 %v3881_v2  ;;  %3171 = vmatpush3.bf16.msra.mxu0 %v3900_v17 }
 0x2c0   :  { %3148 = vmatprep.subr.bf16.mxu1 %v3884_v6  ;;  %3172 = vmatprep.subr.bf16.mxu0 %v3658_v61 }
 0x2c3   :  { %3150 = vmatpush1.bf16.msra.mxu1 %v3893_v11  ;;  %3174 = vmatpush3.bf16.msra.mxu0 %v3908_v20 }
 0x2c4   :  { %3176 = vmatprep.subr.bf16.mxu1 %v3800_v60  ;;  %3207 = vmatprep.subr.bf16.mxu0 %v3658_v61 }
 0x379   :  { %v882_v30 = vpop.f32.mrb[2].mxu1  ;;  %v953_v37 = vpop.f32.mrb[18].mxu0 }
 0x37a   :  { %v3481_v42 = vadd.f32 %v882_v30, %v3967_v51  ;;  %v884_v46 = vpop.f32.mrb[3].mxu1  ;;  %v2729_v49 = vpop.f32.mrb[19].mxu0  ;;  %v971_v60 = vadd.f32 %v3976_v15, %v953_v37  ;;  %v1422_v30 = vld [vmem:[#allocation5 + $0x30] sm:$0xff] }
 0x37b   :  { %v3482_v52 = vadd.f32 %v884_v46, %v3969_v55  ;;  %v1432_v46 = vld [vmem:[#allocation5 + $0x80] sm:$0xff] }
 0x37c   :  { %v2409_v50 = vmul.f32 -1.442695, %v3481_v42  ;;  %v1429_v42 = vld [vmem:[#allocation5 + $0x68] sm:$0xff] }
 0x37d   :  { %v2410_v56 = vmul.f32 -1.442695, %v3482_v52  ;;  %v4099_v49 = vpack.c.bf16 %v1432_v46, %v1429_v42  ;;  %v1431_v52 = vld [vmem:[#allocation5 + $0x78] sm:$0xff] }
 0x37e   :  { %3531 = vpow2.f32 %v2409_v50  ;;  %v1428_v50 = vld [vmem:[#allocation5 + $0x60] sm:$0xff] }
 0x37f   :  { %3533 = vpow2.f32 %v2410_v56  ;;  %v4101_v56 = vpack.c.bf16 %v1431_v52, %v1428_v50 }
 0x388   :  { %v3532_v58 = vpop.eup %3531 }
 0x389   :  { %v961_v59 = vadd.f32 1.0, %v3532_v58  ;;  %v3534_v62 = vpop.eup %3533  ;;  %v1435_v58 = vld [vmem:[#allocation5 + $0x98] sm:$0xff] }
 0x38a   :  { %v968_v63 = vadd.f32 1.0, %v3534_v62 }
 0x38b   :  { %3535 = vrcp.f32 %v961_v59  ;;  %v1438_v59 = vld [vmem:[#allocation5 + $0xb0] sm:$0xff] }
 0x38c   :  { %3537 = vrcp.f32 %v968_v63  ;;  %v4105_v62 = vpack.c.bf16 %v1438_v59, %v1435_v58  ;;  %v1434_v63 = vld [vmem:[#allocation5 + $0x90] sm:$0xff] }
 0x395   :  { %v3536_v3 = vpop.eup %3535 }
 0x396   :  { %v972_v4 = vmul.f32 %v3536_v3, %v971_v60  ;;  %v3538_v9 = vpop.eup %3537  ;;  %v1437_v60 = vld [vmem:[#allocation5 + $0xa8] sm:$0xff] }
 0x397   :  { %v975_v12 = vsub.f32 1.0, %v3538_v9  ;;  %v977_v21 = vmul.f32 %v3538_v9, %v3979_v39  ;;  %v4107_v3 = vpack.c.bf16 %v1437_v60, %v1434_v63 }
 0x398   :  { %v973_v8 = vadd.f32 %v972_v4, %v3953_v28  ;;  %v1441_v4 = vld [vmem:[#allocation5 + $0xc8] sm:$0xff] }
 0x39a   :  { %3539 = vtanh.f32 %v973_v8  ;;  %v1444_v8 = vld [vmem:[#allocation5 + $0xe0] sm:$0xff] }
 0x39b   :  { %v4111_v9 = vpack.c.bf16 %v1444_v8, %v1441_v4 }
 0x3a4   :  { %v3540_v18 = vpop.eup %3539 }
 0x3a5   :  { %v976_v19 = vmul.f32 %v3540_v18, %v975_v12  ;;  %v1440_v12 = vld [vmem:[#allocation5 + $0xc0] sm:$0xff]  ;;  %v1443_v18 = vld [vmem:[#allocation5 + $0xd8] sm:$0xff] }
 0x3a7   :  { %v978_v22 = vadd.f32 %v977_v21, %v976_v19  ;;  %v1442_v19 = vld [vmem:[#allocation5 + $0xd0] sm:$0xff]  ;;  %v4113_v21 = vpack.c.bf16 %v1443_v18, %v1440_v12 }
 0x3a9   :  { %2411 = vst [vmem:[%s4391_s8 + $0x8] sm:$0xff] %v978_v22  ;;  %1097 = vmatmul.mubr.f32.vlgmr.msra.gmra.mrb[4].mxu1 %v978_v22  ;;  %2763 = vmatmul.mubr.f32.vlgmr.msra.gmra.mrb[20].mxu0 %v978_v22 }
 0x3aa   :  { %3178 = vmatpush1.bf16.msra.mxu1 %v3804_v5  ;;  %3209 = vmatpush3.bf16.msra.mxu0 %v3808_v13 }
 0x3ab   :  { %3180 = vmatprep.subr.bf16.mxu1 %v3806_v7  ;;  %3210 = vmatprep.subr.bf16.mxu0 %v3658_v61 }
 0x3ac   :  { %1312 = vmatprep.mubr.f32.mxu1 %v3657_v1  ;;  %2797 = vmatprep.mubr.msk.f32.mxu0 %vm3659_vm10, %v3657_v1 }
 0x3ae   :  { %3182 = vmatpush1.bf16.msra.mxu1 %v3814_v14  ;;  %3212 = vmatpush3.bf16.msra.mxu0 %v3832_v32 }
 0x3af   :  { %3184 = vmatprep.subr.bf16.mxu1 %v3818_v16  ;;  %3213 = vmatprep.subr.bf16.mxu0 %v3658_v61 }
 0x3b2   :  { %3186 = vmatpush1.bf16.msra.mxu1 %v3825_v24  ;;  %3215 = vmatpush3.bf16.msra.mxu0 %v3849_v44 }
 0x3b3   :  { %3188 = vmatprep.subr.bf16.mxu1 %v3829_v26  ;;  %3216 = vmatprep.subr.bf16.mxu0 %v3658_v61 }
 0x3b6   :  { %3190 = vmatpush1.bf16.msra.mxu1 %v3838_v33  ;;  %3218 = vmatpush3.bf16.msra.mxu0 %v3865_v53 }
 0x3b7   :  { %3192 = vmatprep.subr.bf16.mxu1 %v3844_v38  ;;  %3219 = vmatprep.subr.bf16.mxu0 %v3658_v61 }
 0x3ba   :  { %3194 = vmatpush1.bf16.msra.mxu1 %v3854_v45  ;;  %3221 = vmatpush3.bf16.msra.mxu0 %v3877_v0 }
 0x3bb   :  { %3196 = vmatprep.subr.bf16.mxu1 %v3858_v48  ;;  %3222 = vmatprep.subr.bf16.mxu0 %v3658_v61 }
 0x3be   :  { %3198 = vmatpush1.bf16.msra.mxu1 %v3869_v54  ;;  %3224 = vmatpush3.bf16.msra.mxu0 %v3889_v10 }
 0x3bf   :  { %3200 = vmatprep.subr.bf16.mxu1 %v3872_v57  ;;  %3225 = vmatprep.subr.bf16.mxu0 %v3658_v61 }
 0x3c2   :  { %3202 = vmatpush1.bf16.msra.mxu1 %v3881_v2  ;;  %3227 = vmatpush3.bf16.msra.mxu0 %v3900_v17 }
 0x3c3   :  { %3204 = vmatprep.subr.bf16.mxu1 %v3884_v6  ;;  %3228 = vmatprep.subr.bf16.mxu0 %v3658_v61 }
 0x3c6   :  { %3206 = vmatpush1.bf16.msra.mxu1 %v3893_v11  ;;  %3230 = vmatpush3.bf16.msra.mxu0 %v3908_v20 }
 0x3c7   :  { %3263 = vmatprep.subr.bf16.mxu0 %v3658_v61 }
 0x47c   :  { %v1098_v5 = vpop.f32.mrb[4].mxu1  ;;  %v1169_v7 = vpop.f32.mrb[20].mxu0 }
 0x47d   :  { %v3483_v14 = vadd.f32 %v1098_v5, %v3967_v51  ;;  %v1100_v16 = vpop.f32.mrb[5].mxu1  ;;  %v2764_v24 = vpop.f32.mrb[21].mxu0  ;;  %v1187_v0 = vadd.f32 %v3976_v15, %v1169_v7  ;;  %v1447_v7 = vld [vmem:[#allocation5 + $0xf8] sm:$0xff] }
 0x47e   :  { %v3484_v33 = vadd.f32 %v1100_v16, %v3969_v55  ;;  %v1446_v16 = vld [vmem:[#allocation5 + $0xf0] sm:$0xff] }
 0x47f   :  { %v2412_v26 = vmul.f32 -1.442695, %v3483_v14  ;;  %v1450_v14 = vld [vmem:[#allocation5 + $0x110] sm:$0xff] }
 0x480   :  { %v2413_v38 = vmul.f32 -1.442695, %v3484_v33  ;;  %v4120_v24 = vpack.c.bf16 %v1450_v14, %v1447_v7  ;;  %v1448_v33 = vld [vmem:[#allocation5 + $0x100] sm:$0xff] }
 0x481   :  { %3541 = vpow2.f32 %v2412_v26  ;;  %v1449_v26 = vld [vmem:[#allocation5 + $0x108] sm:$0xff] }
 0x482   :  { %3543 = vpow2.f32 %v2413_v38  ;;  %v1451_v38 = vld [vmem:[#allocation5 + $0x118] sm:$0xff] }
 0x48b   :  { %v3542_v45 = vpop.eup %3541 }
 0x48c   :  { %v1177_v48 = vadd.f32 1.0, %v3542_v45  ;;  %v3544_v54 = vpop.eup %3543  ;;  %v4123_v45 = vpack.c.bf16 %v1449_v26, %v1446_v16 }
 0x48d   :  { %v1184_v57 = vadd.f32 1.0, %v3544_v54  ;;  %v1453_v54 = vld [vmem:[#allocation5 + $0x128] sm:$0xff] }
 0x48e   :  { %3545 = vrcp.f32 %v1177_v48  ;;  %v4125_v48 = vpack.c.bf16 %v1451_v38, %v1448_v33 }
 0x48f   :  { %3547 = vrcp.f32 %v1184_v57  ;;  %v1456_v57 = vld [vmem:[#allocation5 + $0x140] sm:$0xff] }
 0x498   :  { %v3546_v2 = vpop.eup %3545 }
 0x499   :  { %v1188_v6 = vmul.f32 %v3546_v2, %v1187_v0  ;;  %v3548_v11 = vpop.eup %3547  ;;  %v1452_v0 = vld [vmem:[#allocation5 + $0x120] sm:$0xff]  ;;  %v4128_v2 = vpack.c.bf16 %v1456_v57, %v1453_v54 }
 0x49a   :  { %v1191_v17 = vsub.f32 1.0, %v3548_v11  ;;  %v1193_v23 = vmul.f32 %v3548_v11, %v978_v22  ;;  %v1445_v22 = vld [vmem:[#allocation5 + $0xe8] sm:$0xff] }
 0x49b   :  { %v1189_v10 = vadd.f32 %v1188_v6, %v3957_v36  ;;  %v1420_v36 = vld [vmem:[#allocation5 + $0x20] sm:$0xff]  ;;  %v4116_v5 = vpack.c.bf16 %v1445_v22, %v1442_v19  ;;  %v1455_v6 = vld [vmem:[#allocation5 + $0x138] sm:$0xff]  ;;  %v1457_v11 = vld [vmem:[#allocation5 + $0x148] sm:$0xff] }
 0x49d   :  { %3549 = vtanh.f32 %v1189_v10  ;;  %v1454_v10 = vld [vmem:[#allocation5 + $0x130] sm:$0xff] }
 0x4a7   :  { %v3550_v20 = vpop.eup %3549 }
 0x4a8   :  { %v1192_v28 = vmul.f32 %v3550_v20, %v1191_v17  ;;  %v4131_v17 = vpack.c.bf16 %v1455_v6, %v1452_v0  ;;  %v1459_v20 = vld [vmem:[#allocation5 + $0x158] sm:$0xff]  ;;  %v1640_v0 = vld [vmem:[#allocation5 + $0x40] sm:$0xff] }
 0x4a9   :  { %v1643_v6 = vld [vmem:[#allocation5 + $0x58] sm:$0xff] }
 0x4aa   :  { %v4068_v25 = vadd.f32 %v1193_v23, %v1192_v28  ;;  %v1462_v28 = vld [vmem:[#allocation5 + $0x170] sm:$0xff]  ;;  %v4135_v23 = vpack.c.bf16 %v1457_v11, %v1454_v10  ;;  %v4188_v10 = vpack.c.bf16 %v1643_v6, %v1640_v0 }
 0x4ab   :  { %v1646_v11 = vld [vmem:[#allocation5 + $0x70] sm:$0xff] }
 0x4ac   :  { %2414 = vst [vmem:[%s4391_s8 + $0x10] sm:$0xff] %v4068_v25  ;;  %1313 = vmatmul.mubr.f32.vlgmr.msra.gmra.mrb[6].mxu1 %v4068_v25  ;;  %2798 = vmatmul.mubr.f32.vlgmr.msra.gmra.mrb[22].mxu0 %v4068_v25 }
 0x4ad   :  { %3265 = vmatpush3.bf16.msra.mxu0 %v3808_v13  ;;  %1528 = vmatprep.mubr.f32.mxu1 %v3657_v1  ;;  %v1417_v13 = vld [vmem:[#allocation5 + $0x8] sm:$0xff] }
 0x4ae   :  { %3266 = vmatprep.subr.bf16.mxu0 %v3658_v61  ;;  %2832 = vmatprep.mubr.msk.f32.mxu0 %vm3659_vm10, %v3657_v1  ;;  %v4087_v27 = vpack.c.bf16 %v1420_v36, %v1417_v13  ;;  %v4137_v13 = vpack.c.bf16 %v1462_v28, %v1459_v20  ;;  %v1458_v36 = vld [vmem:[#allocation5 + $0x150] sm:$0xff]  ;;  %v1649_v20 = vld [vmem:[#allocation5 + $0x88] sm:$0xff] }
 0x4af   :  { %v4192_v28 = vpack.c.bf16 %v1649_v20, %v1646_v11 }
 0x4b0   :  { %3232 = vmatprep.subr.bf16.mxu1 %v4087_v27 }
 0x4b1   :  { %3268 = vmatpush3.bf16.msra.mxu0 %v3832_v32  ;;  %3234 = vmatpush1.bf16.msra.mxu1 %v4089_v35  ;;  %v1423_v32 = vld [vmem:[#allocation5 + $0x38] sm:$0xff] }
 0x4b2   :  { %3269 = vmatprep.subr.bf16.mxu0 %v3658_v61 }
 0x4b5   :  { %3271 = vmatpush3.bf16.msra.mxu0 %v3849_v44  ;;  %v1426_v44 = vld [vmem:[#allocation5 + $0x50] sm:$0xff] }
 0x4b6   :  { %3272 = vmatprep.subr.bf16.mxu0 %v3658_v61  ;;  %v4093_v39 = vpack.c.bf16 %v1426_v44, %v1423_v32  ;;  %v1463_v32 = vld [vmem:[#allocation5 + $0x178] sm:$0xff]  ;;  %v4141_v44 = vpack.c.bf16 %v1461_v29, %v1458_v36  ;;  %v1652_v36 = vld [vmem:[#allocation5 + $0xa0] sm:$0xff] }
 0x4b7   :  { %v1655_v29 = vld [vmem:[#allocation5 + $0xb8] sm:$0xff] }
 0x4b8   :  { %3236 = vmatprep.subr.bf16.mxu1 %v4093_v39 }
 0x4b9   :  { %3274 = vmatpush3.bf16.msra.mxu0 %v3865_v53  ;;  %v1425_v53 = vld [vmem:[#allocation5 + $0x48] sm:$0xff] }
 0x4ba   :  { %3275 = vmatprep.subr.bf16.mxu0 %v3658_v61  ;;  %v4095_v37 = vpack.c.bf16 %v1425_v53, %v1422_v30  ;;  %v4145_v30 = vpack.c.bf16 %v1463_v32, %v1460_v31  ;;  %v4196_v31 = vpack.c.bf16 %v1655_v29, %v1652_v36 }
 0x4bc   :  { %3238 = vmatpush1.bf16.msra.mxu1 %v4095_v37 }
 0x4bd   :  { %3240 = vmatprep.subr.bf16.mxu1 %v4099_v49  ;;  %3277 = vmatpush3.bf16.msra.mxu0 %v4116_v5 }
 0x4be   :  { %3278 = vmatprep.subr.bf16.mxu0 %v3658_v61 }
 0x4c0   :  { %3242 = vmatpush1.bf16.msra.mxu1 %v4101_v56 }
 0x4c1   :  { %3244 = vmatprep.subr.bf16.mxu1 %v4105_v62  ;;  %3280 = vmatpush3.bf16.msra.mxu0 %v4125_v48 }
 0x4c2   :  { %3281 = vmatprep.subr.bf16.mxu0 %v3658_v61 }
 0x4c4   :  { %3246 = vmatpush1.bf16.msra.mxu1 %v4107_v3 }
 0x4c5   :  { %3248 = vmatprep.subr.bf16.mxu1 %v4111_v9  ;;  %3283 = vmatpush3.bf16.msra.mxu0 %v4135_v23 }
 0x4c6   :  { %3284 = vmatprep.subr.bf16.mxu0 %v3658_v61 }
 0x4c8   :  { %3250 = vmatpush1.bf16.msra.mxu1 %v4113_v21 }
 0x4c9   :  { %3252 = vmatprep.subr.bf16.mxu1 %v4120_v24  ;;  %3286 = vmatpush3.bf16.msra.mxu0 %v4145_v30 }
 0x4ca   :  { %3319 = vmatprep.subr.bf16.mxu0 %v3658_v61 }
 0x4cc   :  { %3254 = vmatpush1.bf16.msra.mxu1 %v4123_v45 }
 0x4cd   :  { %3256 = vmatprep.subr.bf16.mxu1 %v4128_v2 }
 0x4d0   :  { %3258 = vmatpush1.bf16.msra.mxu1 %v4131_v17 }
 0x4d1   :  { %3260 = vmatprep.subr.bf16.mxu1 %v4137_v13 }
 0x4d4   :  { %3262 = vmatpush1.bf16.msra.mxu1 %v4141_v44 }
 0x4d5   :  { %3288 = vmatprep.subr.bf16.mxu1 %v4087_v27 }
 0x57f   :  { %v1314_v53 = vpop.f32.mrb[6].mxu1  ;;  %v1385_v42 = vpop.f32.mrb[22].mxu0 }
 0x580   :  { %v3485_v46 = vadd.f32 %v1314_v53, %v3967_v51  ;;  %v1316_v50 = vpop.f32.mrb[7].mxu1  ;;  %v2799_v52 = vpop.f32.mrb[23].mxu0  ;;  %v1403_v18 = vadd.f32 %v3976_v15, %v1385_v42 }
 0x581   :  { %v3486_v59 = vadd.f32 %v1316_v50, %v3969_v55 }
 0x582   :  { %v2415_v58 = vmul.f32 -1.442695, %v3485_v46 }
 0x583   :  { %v2416_v63 = vmul.f32 -1.442695, %v3486_v59 }
 0x584   :  { %3551 = vpow2.f32 %v2415_v58 }
 0x585   :  { %3553 = vpow2.f32 %v2416_v63 }
 0x58e   :  { %v3552_v60 = vpop.eup %3551 }
 0x58f   :  { %v1393_v4 = vadd.f32 1.0, %v3552_v60  ;;  %v3554_v8 = vpop.eup %3553 }
 0x590   :  { %v1400_v12 = vadd.f32 1.0, %v3554_v8 }
 0x591   :  { %3555 = vrcp.f32 %v1393_v4 }
 0x592   :  { %3557 = vrcp.f32 %v1400_v12 }
 0x59b   :  { %v3556_v19 = vpop.eup %3555 }
 0x59c   :  { %v1404_v22 = vmul.f32 %v3556_v19, %v1403_v18  ;;  %v3558_v14 = vpop.eup %3557 }
 0x59d   :  { %v1407_v16 = vsub.f32 1.0, %v3558_v14  ;;  %v1409_v38 = vmul.f32 %v3558_v14, %v4068_v25  ;;  %v1637_v25 = vld [vmem:[#allocation5 + $0x28] sm:$0xff] }
 0x59e   :  { %v1405_v7 = vadd.f32 %v1404_v22, %v3955_v34  ;;  %v1634_v34 = vld [vmem:[#allocation5 + $0x10] sm:$0xff] }
 0x59f   :  { %v4184_v57 = vpack.c.bf16 %v1637_v25, %v1634_v34 }
 0x5a0   :  { %3559 = vtanh.f32 %v1405_v7 }
 0x5aa   :  { %v3560_v26 = vpop.eup %3559 }
 0x5ab   :  { %v1408_v33 = vmul.f32 %v3560_v26, %v1407_v16 }
 0x5ad   :  { %v4157_v54 = vadd.f32 %v1409_v38, %v1408_v33 }
 0x5af   :  { %2417 = vst [vmem:[%s4391_s8 + $0x18] sm:$0xff] %v4157_v54  ;;  %1529 = vmatmul.mubr.f32.vlgmr.msra.gmra.mrb[8].mxu1 %v4157_v54  ;;  %2833 = vmatmul.mubr.f32.vlgmr.msra.gmra.mrb[24].mxu0 %v4157_v54 }
 0x5b0   :  { %3290 = vmatpush1.bf16.msra.mxu1 %v4089_v35  ;;  %1744 = vmatprep.mubr.f32.mxu1 %v3657_v1 }
 0x5b1   :  { %3292 = vmatprep.subr.bf16.mxu1 %v4093_v39  ;;  %2867 = vmatprep.mubr.msk.f32.mxu0 %vm3659_vm10, %v3657_v1 }
 0x5b2   :  { %3321 = vmatpush3.bf16.msra.mxu0 %v4184_v57 }
 0x5b3   :  { %3322 = vmatprep.subr.bf16.mxu0 %v3658_v61 }
 0x5b4   :  { %3294 = vmatpush1.bf16.msra.mxu1 %v4095_v37 }
 0x5b5   :  { %3296 = vmatprep.subr.bf16.mxu1 %v4099_v49 }
 0x5b6   :  { %3324 = vmatpush3.bf16.msra.mxu0 %v4188_v10 }
 0x5b7   :  { %3325 = vmatprep.subr.bf16.mxu0 %v3658_v61 }
 0x5b8   :  { %3298 = vmatpush1.bf16.msra.mxu1 %v4101_v56 }
 0x5b9   :  { %3300 = vmatprep.subr.bf16.mxu1 %v4105_v62 }
 0x5ba   :  { %3327 = vmatpush3.bf16.msra.mxu0 %v4192_v28 }
 0x5bb   :  { %3328 = vmatprep.subr.bf16.mxu0 %v3658_v61 }
 0x5bc   :  { %3302 = vmatpush1.bf16.msra.mxu1 %v4107_v3 }
 0x5bd   :  { %3304 = vmatprep.subr.bf16.mxu1 %v4111_v9 }
 0x5be   :  { %3330 = vmatpush3.bf16.msra.mxu0 %v4196_v31 }
 0x5bf   :  { %3331 = vmatprep.subr.bf16.mxu0 %v3658_v61 }
 0x5c0   :  { %3306 = vmatpush1.bf16.msra.mxu1 %v4113_v21 }
 0x5c1   :  { %3308 = vmatprep.subr.bf16.mxu1 %v4120_v24 }
 0x5c2   :  { %3333 = vmatpush3.bf16.msra.mxu0 %v4116_v5 }
 0x5c3   :  { %3334 = vmatprep.subr.bf16.mxu0 %v3658_v61 }
 0x5c4   :  { %3310 = vmatpush1.bf16.msra.mxu1 %v4123_v45 }
 0x5c5   :  { %3312 = vmatprep.subr.bf16.mxu1 %v4128_v2 }
 0x5c6   :  { %3336 = vmatpush3.bf16.msra.mxu0 %v4125_v48 }
 0x5c7   :  { %3337 = vmatprep.subr.bf16.mxu0 %v3658_v61 }
 0x5c8   :  { %3314 = vmatpush1.bf16.msra.mxu1 %v4131_v17 }
 0x5c9   :  { %3316 = vmatprep.subr.bf16.mxu1 %v4137_v13 }
 0x5ca   :  { %3339 = vmatpush3.bf16.msra.mxu0 %v4135_v23 }
 0x5cb   :  { %3340 = vmatprep.subr.bf16.mxu0 %v3658_v61 }
 0x5cc   :  { %3318 = vmatpush1.bf16.msra.mxu1 %v4141_v44 }
 0x5cd   :  { %3344 = vmatprep.subr.bf16.mxu1 %v4087_v27 }
 0x5ce   :  { %3342 = vmatpush3.bf16.msra.mxu0 %v4145_v30 }
 0x5cf   :  { %3375 = vmatprep.subr.bf16.mxu0 %v3658_v61 }
 0x682   :  { %v1530_v32 = vpop.f32.mrb[8].mxu1  ;;  %v1601_v53 = vpop.f32.mrb[24].mxu0 }
 0x683   :  { %v3487_v42 = vadd.f32 %v1530_v32, %v3967_v51  ;;  %v1532_v46 = vpop.f32.mrb[9].mxu1  ;;  %v2834_v50 = vpop.f32.mrb[25].mxu0  ;;  %v1619_v12 = vadd.f32 %v3976_v15, %v1601_v53 }
 0x684   :  { %v3488_v58 = vadd.f32 %v1532_v46, %v3969_v55 }
 0x685   :  { %v2418_v52 = vmul.f32 -1.442695, %v3487_v42 }
 0x686   :  { %v2419_v59 = vmul.f32 -1.442695, %v3488_v58 }
 0x687   :  { %3561 = vpow2.f32 %v2418_v52 }
 0x688   :  { %3563 = vpow2.f32 %v2419_v59 }
 0x691   :  { %v3562_v63 = vpop.eup %3561 }
 0x692   :  { %v1609_v60 = vadd.f32 1.0, %v3562_v63  ;;  %v3564_v4 = vpop.eup %3563 }
 0x693   :  { %v1616_v8 = vadd.f32 1.0, %v3564_v4 }
 0x694   :  { %3565 = vrcp.f32 %v1609_v60 }
 0x695   :  { %3567 = vrcp.f32 %v1616_v8 }
 0x69e   :  { %v3566_v18 = vpop.eup %3565 }
 0x69f   :  { %v1620_v19 = vmul.f32 %v3566_v18, %v1619_v12  ;;  %v3568_v7 = vpop.eup %3567  ;;  %v2281_v12 = vld [vmem:[%s4389_s6 + $0x20] sm:$0xff]  ;;  %v2282_v18 = vld [vmem:[%s4389_s6 + $0x28] sm:$0xff] }
 0x6a0   :  { %v1623_v14 = vsub.f32 1.0, %v3568_v7  ;;  %v1625_v33 = vmul.f32 %v3568_v7, %v4157_v54  ;;  %v2284_v7 = vld [vmem:[%s4389_s6 + $0x38] sm:$0xff] }
 0x6a1   :  { %v1621_v22 = vadd.f32 %v1620_v19, %v3961_v41  ;;  %v3462_v19 = vpack.c.bf16 %v2282_v18, %v2281_v12 }
 0x6a3   :  { %3569 = vtanh.f32 %v1621_v22  ;;  %v2283_v22 = vld [vmem:[%s4389_s6 + $0x30] sm:$0xff] }
 0x6ad   :  { %v3570_v16 = vpop.eup %3569 }
 0x6ae   :  { %v1624_v26 = vmul.f32 %v3570_v16, %v1623_v14  ;;  %v3465_v14 = vpack.c.bf16 %v2284_v7, %v2283_v22  ;;  %v2285_v16 = vld [vmem:[%s4389_s6 + $0x40] sm:$0xff] }
 0x6b0   :  { %v4213_v38 = vadd.f32 %v1625_v33, %v1624_v26  ;;  %v2286_v26 = vld [vmem:[%s4389_s6 + $0x48] sm:$0xff] }
 0x6b1   :  { %v3468_v33 = vpack.c.bf16 %v2286_v26, %v2285_v16 }
 0x6b2   :  { %2420 = vst [vmem:[%s4391_s8 + $0x20] sm:$0xff] %v4213_v38  ;;  %1745 = vmatmul.mubr.f32.vlgmr.msra.gmra.mrb[10].mxu1 %v4213_v38  ;;  %2868 = vmatmul.mubr.f32.vlgmr.msra.gmra.mrb[26].mxu0 %v4213_v38 }
 0x6b3   :  { %3346 = vmatpush1.bf16.msra.mxu1 %v4089_v35  ;;  %3377 = vmatpush3.bf16.msra.mxu0 %v4184_v57 }
 0x6b4   :  { %3348 = vmatprep.subr.bf16.mxu1 %v4093_v39  ;;  %3378 = vmatprep.subr.bf16.mxu0 %v3658_v61 }
 0x6b5   :  { %1960 = vmatprep.mubr.f32.mxu1 %v3657_v1  ;;  %2902 = vmatprep.mubr.msk.f32.mxu0 %vm3659_vm10, %v3657_v1 }
 0x6b7   :  { %3350 = vmatpush1.bf16.msra.mxu1 %v4095_v37  ;;  %3380 = vmatpush3.bf16.msra.mxu0 %v4188_v10 }
 0x6b8   :  { %3352 = vmatprep.subr.bf16.mxu1 %v4099_v49  ;;  %3381 = vmatprep.subr.bf16.mxu0 %v3658_v61 }
 0x6bb   :  { %3354 = vmatpush1.bf16.msra.mxu1 %v4101_v56  ;;  %3383 = vmatpush3.bf16.msra.mxu0 %v4192_v28 }
 0x6bc   :  { %3356 = vmatprep.subr.bf16.mxu1 %v4105_v62  ;;  %3384 = vmatprep.subr.bf16.mxu0 %v3658_v61 }
 0x6bf   :  { %3358 = vmatpush1.bf16.msra.mxu1 %v4107_v3  ;;  %3386 = vmatpush3.bf16.msra.mxu0 %v4196_v31 }
 0x6c0   :  { %3360 = vmatprep.subr.bf16.mxu1 %v4111_v9  ;;  %3387 = vmatprep.subr.bf16.mxu0 %v3658_v61 }
 0x6c3   :  { %3362 = vmatpush1.bf16.msra.mxu1 %v4113_v21  ;;  %3389 = vmatpush3.bf16.msra.mxu0 %v4116_v5 }
 0x6c4   :  { %3364 = vmatprep.subr.bf16.mxu1 %v4120_v24  ;;  %3390 = vmatprep.subr.bf16.mxu0 %v3658_v61 }
 0x6c7   :  { %3366 = vmatpush1.bf16.msra.mxu1 %v4123_v45  ;;  %3392 = vmatpush3.bf16.msra.mxu0 %v4125_v48 }
 0x6c8   :  { %3368 = vmatprep.subr.bf16.mxu1 %v4128_v2  ;;  %3393 = vmatprep.subr.bf16.mxu0 %v3658_v61 }
 0x6cb   :  { %3370 = vmatpush1.bf16.msra.mxu1 %v4131_v17  ;;  %3395 = vmatpush3.bf16.msra.mxu0 %v4135_v23 }
 0x6cc   :  { %3372 = vmatprep.subr.bf16.mxu1 %v4137_v13  ;;  %3396 = vmatprep.subr.bf16.mxu0 %v3658_v61 }
 0x6cf   :  { %3374 = vmatpush1.bf16.msra.mxu1 %v4141_v44  ;;  %3398 = vmatpush3.bf16.msra.mxu0 %v4145_v30 }
 0x6d0   :  { %3400 = vmatprep.subr.bf16.mxu1 %v4087_v27  ;;  %3431 = vmatprep.subr.bf16.mxu0 %v3658_v61 }
 0x785   :  { %v1746_v41 = vpop.f32.mrb[10].mxu1  ;;  %v1817_v54 = vpop.f32.mrb[26].mxu0 }
 0x786   :  { %v3489_v34 = vadd.f32 %v1746_v41, %v3967_v51  ;;  %v1748_v25 = vpop.f32.mrb[11].mxu1  ;;  %v2869_v0 = vpop.f32.mrb[27].mxu0  ;;  %v1835_v27 = vadd.f32 %v3976_v15, %v1817_v54  ;;  %v2288_v41 = vld [vmem:[%s4389_s6 + $0x58] sm:$0xff] }
 0x787   :  { %v3490_v11 = vadd.f32 %v1748_v25, %v3969_v55  ;;  %v2290_v25 = vld [vmem:[%s4389_s6 + $0x68] sm:$0xff] }
 0x788   :  { %v2421_v6 = vmul.f32 -1.442695, %v3489_v34  ;;  %v2289_v34 = vld [vmem:[%s4389_s6 + $0x60] sm:$0xff] }
 0x789   :  { %v2422_v20 = vmul.f32 -1.442695, %v3490_v11  ;;  %v3474_v0 = vpack.c.bf16 %v2290_v25, %v2289_v34  ;;  %v2292_v11 = vld [vmem:[%s4389_s6 + $0x78] sm:$0xff] }
 0x78a   :  { %3571 = vpow2.f32 %v2421_v6  ;;  %v2291_v6 = vld [vmem:[%s4389_s6 + $0x70] sm:$0xff] }
 0x78b   :  { %3573 = vpow2.f32 %v2422_v20  ;;  %v3477_v20 = vpack.c.bf16 %v2292_v11, %v2291_v6 }
 0x794   :  { %v3572_v36 = vpop.eup %3571 }
 0x795   :  { %v1825_v29 = vadd.f32 1.0, %v3572_v36  ;;  %v3574_v32 = vpop.eup %3573 }
 0x796   :  { %v1832_v53 = vadd.f32 1.0, %v3574_v32 }
 0x797   :  { %3575 = vrcp.f32 %v1825_v29 }
 0x798   :  { %3577 = vrcp.f32 %v1832_v53 }
 0x7a1   :  { %v3576_v42 = vpop.eup %3575 }
 0x7a2   :  { %v1836_v46 = vmul.f32 %v3576_v42, %v1835_v27  ;;  %v3578_v52 = vpop.eup %3577 }
 0x7a3   :  { %v1839_v58 = vsub.f32 1.0, %v3578_v52  ;;  %v1841_v60 = vmul.f32 %v3578_v52, %v4213_v38  ;;  %v2287_v38 = vld [vmem:[%s4389_s6 + $0x50] sm:$0xff] }
 0x7a4   :  { %v1837_v50 = vadd.f32 %v1836_v46, %v3959_v40  ;;  %v3471_v54 = vpack.c.bf16 %v2288_v41, %v2287_v38 }
 0x7a6   :  { %3579 = vtanh.f32 %v1837_v50 }
 0x7b0   :  { %v3580_v59 = vpop.eup %3579 }
 0x7b1   :  { %v1840_v63 = vmul.f32 %v3580_v59, %v1839_v58 }
 0x7b3   :  { %v1842_v4 = vadd.f32 %v1841_v60, %v1840_v63 }
 0x7b5   :  { %2423 = vst [vmem:[%s4391_s8 + $0x28] sm:$0xff] %v1842_v4  ;;  %1961 = vmatmul.mubr.f32.vlgmr.msra.gmra.mrb[12].mxu1 %v1842_v4  ;;  %2903 = vmatmul.mubr.f32.vlgmr.msra.gmra.mrb[28].mxu0 %v1842_v4 }
 0x7b6   :  { %3402 = vmatpush1.bf16.msra.mxu1 %v4089_v35  ;;  %3433 = vmatpush3.bf16.msra.mxu0 %v4184_v57 }
 0x7b7   :  { %3404 = vmatprep.subr.bf16.mxu1 %v4093_v39  ;;  %3434 = vmatprep.subr.bf16.mxu0 %v3658_v61 }
 0x7b8   :  { %2176 = vmatprep.mubr.f32.mxu1 %v3657_v1  ;;  %2937 = vmatprep.mubr.msk.f32.mxu0 %vm3659_vm10, %v3657_v1 }
 0x7ba   :  { %3406 = vmatpush1.bf16.msra.mxu1 %v4095_v37  ;;  %3436 = vmatpush3.bf16.msra.mxu0 %v4188_v10 }
 0x7bb   :  { %3408 = vmatprep.subr.bf16.mxu1 %v4099_v49  ;;  %3437 = vmatprep.subr.bf16.mxu0 %v3658_v61 }
 0x7be   :  { %3410 = vmatpush1.bf16.msra.mxu1 %v4101_v56  ;;  %3439 = vmatpush3.bf16.msra.mxu0 %v4192_v28 }
 0x7bf   :  { %3412 = vmatprep.subr.bf16.mxu1 %v4105_v62  ;;  %3440 = vmatprep.subr.bf16.mxu0 %v3658_v61 }
 0x7c2   :  { %3414 = vmatpush1.bf16.msra.mxu1 %v4107_v3  ;;  %3442 = vmatpush3.bf16.msra.mxu0 %v4196_v31  ;;  %v2279_v31 = vld [vmem:[%s4389_s6 + $0x10] sm:$0xff] }
 0x7c3   :  { %3416 = vmatprep.subr.bf16.mxu1 %v4111_v9  ;;  %3443 = vmatprep.subr.bf16.mxu0 %v3658_v61 }
 0x7c6   :  { %3418 = vmatpush1.bf16.msra.mxu1 %v4113_v21  ;;  %3445 = vmatpush3.bf16.msra.mxu0 %v4116_v5 }
 0x7c7   :  { %3420 = vmatprep.subr.bf16.mxu1 %v4120_v24  ;;  %3446 = vmatprep.subr.bf16.mxu0 %v3658_v61 }
 0x7ca   :  { %3422 = vmatpush1.bf16.msra.mxu1 %v4123_v45  ;;  %3448 = vmatpush3.bf16.msra.mxu0 %v4125_v48 }
 0x7cb   :  { %3424 = vmatprep.subr.bf16.mxu1 %v4128_v2  ;;  %3449 = vmatprep.subr.bf16.mxu0 %v3658_v61 }
 0x7ce   :  { %3426 = vmatpush1.bf16.msra.mxu1 %v4131_v17  ;;  %3451 = vmatpush3.bf16.msra.mxu0 %v4135_v23 }
 0x7cf   :  { %3428 = vmatprep.subr.bf16.mxu1 %v4137_v13  ;;  %3452 = vmatprep.subr.bf16.mxu0 %v3658_v61 }
 0x7d2   :  { %3430 = vmatpush1.bf16.msra.mxu1 %v4141_v44  ;;  %3454 = vmatpush3.bf16.msra.mxu0 %v4145_v30 }
 0x7d3   :  { %3455 = vmatprep.subr.bf16.mxu1 %v3658_v61 }
 0x888   :  { %v1962_v40 = vpop.f32.mrb[12].mxu1  ;;  %v2033_v35 = vpop.f32.mrb[28].mxu0 }
 0x889   :  { %v3491_v39 = vadd.f32 %v1962_v40, %v3967_v51  ;;  %v1964_v37 = vpop.f32.mrb[13].mxu1  ;;  %v2904_v49 = vpop.f32.mrb[29].mxu0  ;;  %v2051_v45 = vadd.f32 %v3976_v15, %v2033_v35  ;;  %v2278_v15 = vld [vmem:[%s4389_s6 + $0x8] sm:$0xff] }
 0x88a   :  { %v3492_v62 = vadd.f32 %v1964_v37, %v3969_v55 }
 0x88b   :  { %v2424_v56 = vmul.f32 -1.442695, %v3491_v39 }
 0x88c   :  { %v2425_v3 = vmul.f32 -1.442695, %v3492_v62  ;;  %v2430_v62 = vld [vmem:[%s4390_s7] ss:$0 sm:$0xff] }
 0x88d   :  { %3581 = vpow2.f32 %v2424_v56 }
 0x88e   :  { %3583 = vpow2.f32 %v2425_v3 }
 0x897   :  { %v3582_v9 = vpop.eup %3581 }
 0x898   :  { %v2041_v21 = vadd.f32 1.0, %v3582_v9  ;;  %v3584_v5 = vpop.eup %3583 }
 0x899   :  { %v2048_v24 = vadd.f32 1.0, %v3584_v5 }
 0x89a   :  { %3585 = vrcp.f32 %v2041_v21 }
 0x89b   :  { %3587 = vrcp.f32 %v2048_v24 }
 0x8a4   :  { %v3586_v48 = vpop.eup %3585 }
 0x8a5   :  { %v2052_v2 = vmul.f32 %v3586_v48, %v2051_v45  ;;  %v3588_v23 = vpop.eup %3587 }
 0x8a6   :  { %v2055_v13 = vsub.f32 1.0, %v3588_v23  ;;  %v2057_v57 = vmul.f32 %v3588_v23, %v1842_v4 }
 0x8a7   :  { %v2053_v17 = vadd.f32 %v2052_v2, %v3965_v47  ;;  %v2277_v47 = vld [vmem:[%s4389_s6] sm:$0xff] }
 0x8a8   :  { %v3456_v28 = vpack.c.bf16 %v2278_v15, %v2277_v47 }
 0x8a9   :  { %3589 = vtanh.f32 %v2053_v17 }
 0x8b3   :  { %v3590_v44 = vpop.eup %3589 }
 0x8b4   :  { %v2056_v30 = vmul.f32 %v3590_v44, %v2055_v13 }
 0x8b6   :  { %v4302_v10 = vadd.f32 %v2057_v57, %v2056_v30 }
 0x8b8   :  { %2426 = vst [vmem:[%s4391_s8 + $0x30] sm:$0xff] %v4302_v10  ;;  %2177 = vmatmul.mubr.f32.vlgmr.msra.gmra.mrb[14].mxu1 %v4302_v10  ;;  %2938 = vmatmul.mubr.f32.vlgmr.msra.gmra.mrb[30].mxu0 %v4302_v10 }
 0x8b9   :  { %2972 = vmatprep.mubr.msk.f32.mxu1 %vm3659_vm10, %v3657_v1  ;;  %3457 = vmatpush3.bf16.msra.mxu1 %v3456_v28  ;;  %v2280_v1 = vld [vmem:[%s4389_s6 + $0x18] sm:$0xff] }
 0x8ba   :  { %3458 = vmatprep.subr.bf16.mxu1 %v3658_v61  ;;  %v3459_v8 = vpack.c.bf16 %v2280_v1, %v2279_v31 }
 0x8bd   :  { %3460 = vmatpush3.bf16.msra.mxu1 %v3459_v8 }
 0x8be   :  { %3461 = vmatprep.subr.bf16.mxu1 %v3658_v61 }
 0x8c1   :  { %3463 = vmatpush3.bf16.msra.mxu1 %v3462_v19 }
 0x8c2   :  { %3464 = vmatprep.subr.bf16.mxu1 %v3658_v61 }
 0x8c5   :  { %3466 = vmatpush3.bf16.msra.mxu1 %v3465_v14 }
 0x8c6   :  { %3467 = vmatprep.subr.bf16.mxu1 %v3658_v61 }
 0x8c9   :  { %3469 = vmatpush3.bf16.msra.mxu1 %v3468_v33 }
 0x8ca   :  { %3470 = vmatprep.subr.bf16.mxu1 %v3658_v61 }
 0x8cd   :  { %3472 = vmatpush3.bf16.msra.mxu1 %v3471_v54 }
 0x8ce   :  { %3473 = vmatprep.subr.bf16.mxu1 %v3658_v61 }
 0x8d1   :  { %3475 = vmatpush3.bf16.msra.mxu1 %v3474_v0 }
 0x8d2   :  { %3476 = vmatprep.subr.bf16.mxu1 %v3658_v61  ;;  %v3603_v61 = vld [vmem:[%s4388_s5] ss:$0 sm:$0xff] }
 0x8d5   :  { %3478 = vmatpush3.bf16.msra.mxu1 %v3477_v20 }
 0x98b   :  { %v2178_v36 = vpop.f32.mrb[14].mxu1  ;;  %v2249_v29 = vpop.f32.mrb[30].mxu0 }
 0x98c   :  { %v3493_v32 = vadd.f32 %v2178_v36, %v3967_v51  ;;  %v2180_v53 = vpop.f32.mrb[15].mxu1  ;;  %v2939_v27 = vpop.f32.mrb[31].mxu0  ;;  %v2267_v60 = vadd.f32 %v3603_v61, %v2249_v29 }
 0x98d   :  { %v3494_v46 = vadd.f32 %v2180_v53, %v3969_v55 }
 0x98e   :  { %v2427_v42 = vmul.f32 -1.442695, %v3493_v32 }
 0x98f   :  { %v2428_v50 = vmul.f32 -1.442695, %v3494_v46 }
 0x990   :  { %3591 = vpow2.f32 %v2427_v42 }
 0x991   :  { %3593 = vpow2.f32 %v2428_v50 }
 0x99a   :  { %v3592_v52 = vpop.eup %3591 }
 0x99b   :  { %v2257_v58 = vadd.f32 1.0, %v3592_v52  ;;  %v3594_v59 = vpop.eup %3593 }
 0x99c   :  { %v2264_v63 = vadd.f32 1.0, %v3594_v59 }
 0x99d   :  { %3595 = vrcp.f32 %v2257_v58 }
 0x99e   :  { %3597 = vrcp.f32 %v2264_v63 }
 0x9a7   :  { %v3596_v4 = vpop.eup %3595 }
 0x9a8   :  { %v2268_v51 = vmul.f32 %v3596_v4, %v2267_v60  ;;  %v3598_v55 = vpop.eup %3597 }
 0x9a9   :  { %v2271_v35 = vsub.f32 1.0, %v3598_v55  ;;  %v2273_v49 = vmul.f32 %v3598_v55, %v4302_v10 }
 0x9aa   :  { %v2269_v40 = vadd.f32 %v2268_v51, %v3963_v43 }
 0x9ac   :  { %3599 = vtanh.f32 %v2269_v40 }
 0x9b6   :  { %v3600_v39 = vpop.eup %3599 }
 0x9b7   :  { %v2272_v37 = vmul.f32 %v3600_v39, %v2271_v35 }
 0x9b9   :  { %v2274_v56 = vadd.f32 %v2273_v49, %v2272_v37 }
 0x9bb   :  { %2429 = vst [vmem:[%s4391_s8 + $0x38] sm:$0xff] %v2274_v56  ;;  %2973 = vmatmul.mubr.f32.vlgmr.msra.gmra.mrb[16].mxu1 %v2274_v56 }
 0xa8e   :  { %v2366_v3 = vpop.f32.mrb[16].mxu1 }
 0xa8f   :  { %v2367_v9 = vadd.f32 %v2430_v62, %v2366_v3  ;;  %v2974_v43 = vpop.f32.mrb[17].mxu1 }
 0xa91   :  { %3601 = vtanh.f32 %v2367_v9 }
 0xa9b   :  { %v3602_v21 = vpop.eup %3601 }
 0xa9c   :  { %2371 = vst [vmem:[%s4392_s9] sm:$0xff] %v3602_v21 }
 0xa9d   :  { %2380 = vsyncpa [#allocation4], 1 }
 0xa9e   :  { %2381 = vsyncpa [#allocation6], 1 }

</bundles_post_ra>
